<compile_context>
chip_gen: v5e
topology: v5e:2x2
jax: 0.10.0
libtpu: 0.0.40
codegen_flags: <defaults>
</compile_context>

<pallas_src>
import math
import functools

import jax
import jax.numpy as jnp
from jax.experimental import pallas as pl
from jax.experimental.pallas import tpu as pltpu  # noqa: F401  (TPU backend import)


# ----------------------------- config ---------------------------------------
HIDDEN = 32          # config.hidden_size
NUM_HEADS = 4        # config.transformer['num_heads']
HEAD_DIM = HIDDEN // NUM_HEADS
MLP_DIM = 64         # config.transformer['mlp_dim']
NUM_LAYERS = 2       # config.transformer['num_layers']
BATCH = 2
SEQ = 8
LN_EPS = 1e-6


# --------------------------- shared math helpers ------------------------------
def _layer_norm(x, g, b):
    # x: (..., H); g/b broadcastable to x
    mu = jnp.mean(x, axis=-1, keepdims=True)
    var = jnp.mean((x - mu) ** 2, axis=-1, keepdims=True)
    return (x - mu) * jax.lax.rsqrt(var + LN_EPS) * g + b


def _gelu_exact(x):
    # matches torch.nn.functional.gelu (erf form)
    return 0.5 * x * (1.0 + jax.lax.erf(x / jnp.sqrt(2.0).astype(x.dtype)))


# ------------------------------ fused kernel ----------------------------------
def fused_encoder_kernel(x_ref,
                         ln_g_ref, ln_b_ref,
                         wqkv_ref, bqkv_ref, wo_ref, bo_ref,
                         w1_ref, b1_ref, w2_ref, b2_ref,
                         enc_g_ref, enc_b_ref,
                         o_ref, *, batch, seq):
    """All NUM_LAYERS encoder blocks + final LayerNorm in a single kernel invocation."""
    H, NH, HD = HIDDEN, NUM_HEADS, HEAD_DIM

    x = x_ref[...]                         # (B*S, H) activations, VMEM-resident throughout
    ln_g = ln_g_ref[...]                   # (L, 2, H)   [:,0]=attention_norm  [:,1]=ffn_norm
    ln_b = ln_b_ref[...]                   # (L, 2, H)
    wqkv = wqkv_ref[...]                   # (L, H, 3H)  fused Q|K|V weights (pre-transposed)
    bqkv = bqkv_ref[...]                   # (L, 3H)
    wo = wo_ref[...]                       # (L, H, H)
    bo = bo_ref[...]                       # (L, H)
    w1 = w1_ref[...]                       # (L, H, MLP)
    b1 = b1_ref[...]                       # (L, MLP)
    w2 = w2_ref[...]                       # (L, MLP, H)
    b2 = b2_ref[...]                       # (L, H)

    scale = 1.0 / math.sqrt(HD)

    for l in range(NUM_LAYERS):            # static unroll over layers; weights already in VMEM
        h = x

        # ---- attention_norm + fused QKV projection (one MXU matmul, 96 output lanes) ----
        xn = _layer_norm(x, ln_g[l, 0], ln_b[l, 0])
        qkv = jnp.dot(xn, wqkv[l], preferred_element_type=jnp.float32) + bqkv[l]   # (B*S, 3H)
        q3 = qkv[:, 0 * H:1 * H].reshape(batch, seq, H)
        k3 = qkv[:, 1 * H:2 * H].reshape(batch, seq, H)
        v3 = qkv[:, 2 * H:3 * H].reshape(batch, seq, H)

        # ---- multi-head attention: static head loop, batched over B via 3-D einsums ----
        ctx_heads = []
        for n in range(NH):
            sl = slice(n * HD, (n + 1) * HD)
            qh, kh, vh = q3[..., sl], k3[..., sl], v3[..., sl]          # (B, S, HD)
            s = jnp.einsum("bqd,bkd->bqk", qh, kh,
                           preferred_element_type=jnp.float32) * scale  # (B, S, S)
            s = s - jnp.max(s, axis=-1, keepdims=True)
            p = jnp.exp(s)
            # EUP-backed reciprocal for the softmax denominator (approx=False keeps
            # full precision so the 1e-4 reference check stays deterministic).
            p = p * pl.reciprocal(jnp.sum(p, axis=-1, keepdims=True), approx=False)
            ctx_heads.append(jnp.einsum("bqk,bkd->bqd", p, vh,
                                        preferred_element_type=jnp.float32))       # (B, S, HD)
        ctx = jnp.concatenate(ctx_heads, axis=-1).reshape(batch * seq, H)

        # ---- output projection + residual 1 ----
        x = jnp.dot(ctx, wo[l], preferred_element_type=jnp.float32) + bo[l] + h
        hh = x

        # ---- ffn_norm + MLP + residual 2 ----
        xn2 = _layer_norm(x, ln_g[l, 1], ln_b[l, 1])
        y = jnp.dot(xn2, w1[l], preferred_element_type=jnp.float32) + b1[l]
        y = _gelu_exact(y)
        y = jnp.dot(y, w2[l], preferred_element_type=jnp.float32) + b2[l]
        x = y + hh

    # ---- final encoder_norm ----
    o_ref[...] = _layer_norm(x, enc_g_ref[0], enc_b_ref[0]).astype(o_ref.dtype)


# ------------------------------ wrapper ---------------------------------------
def transformer_forward(x, params):
    """Equivalent of Transformer(config, vis=False).forward(input_ids)."""
    B, S, H = x.shape
    x2 = x.reshape(B * S, H)
    kernel = functools.partial(fused_encoder_kernel, batch=B, seq=S)
    out2 = pl.pallas_call(
        kernel,
        out_shape=jax.ShapeDtypeStruct((B * S, H), x.dtype),
        # No grid: whole-array refs in VMEM (total footprint ~70 KB), single invocation.
    )(x2,
      params["ln_g"], params["ln_b"],
      params["wqkv"], params["bqkv"], params["wo"], params["bo"],
      params["w1"], params["b1"], params["w2"], params["b2"],
      params["enc_g"], params["enc_b"])
    encoded = out2.reshape(B, S, H)
    attn_weights = []          # vis=False -> no attention weights collected
    return encoded, attn_weights


# ------------------------------ param init -----------------------------------
def init_params(key):
    L, H, M = NUM_LAYERS, HIDDEN, MLP_DIM
    ks = jax.random.split(key, 8)

    def rnd(k, shape, scale):
        return jax.random.normal(k, shape, jnp.float32) * scale

    return dict(
        ln_g=jnp.ones((L, 2, H), jnp.float32),        # [:,0]=attention_norm  [:,1]=ffn_norm
        ln_b=jnp.zeros((L, 2, H), jnp.float32),
        wqkv=rnd(ks[0], (L, H, 3 * H), 1.0 / math.sqrt(H)),   # fused Q|K|V, stored [in, out]
        bqkv=rnd(ks[1], (L, 3 * H), 0.02),
        wo=rnd(ks[2], (L, H, H), 1.0 / math.sqrt(H)),
        bo=rnd(ks[3], (L, H), 0.02),
        w1=rnd(ks[4], (L, H, M), 1.0 / math.sqrt(H)),         # Mlp xavier-ish
        b1=rnd(ks[5], (L, M), 1e-6),
        w2=rnd(ks[6], (L, M, H), 1.0 / math.sqrt(M)),
        b2=rnd(ks[7], (L, H), 1e-6),
        enc_g=jnp.ones((1, H), jnp.float32),
        enc_b=jnp.zeros((1, H), jnp.float32),
    )


# -------------------------- plain-JAX reference -------------------------------
def reference_forward(x, p):
    B, S, H = x.shape
    NH, HD = NUM_HEADS, HEAD_DIM
    for l in range(NUM_LAYERS):
        h = x
        xn = _layer_norm(x, p["ln_g"][l, 0], p["ln_b"][l, 0])
        qkv = xn @ p["wqkv"][l] + p["bqkv"][l]
        q, k, v = jnp.split(qkv, 3, axis=-1)
        qh = q.reshape(B, S, NH, HD).transpose(0, 2, 1, 3)
        kh = k.reshape(B, S, NH, HD).transpose(0, 2, 1, 3)
        vh = v.reshape(B, S, NH, HD).transpose(0, 2, 1, 3)
        scores = jnp.einsum("bhqd,bhkd->bhqk", qh, kh) / math.sqrt(HD)
        probs = jax.nn.softmax(scores, axis=-1)
        ctx = jnp.einsum("bhqk,bhkd->bhqd", probs, vh).transpose(0, 2, 1, 3).reshape(B, S, H)
        x = ctx @ p["wo"][l] + p["bo"][l] + h
        hh = x
        xn2 = _layer_norm(x, p["ln_g"][l, 1], p["ln_b"][l, 1])
        y = _gelu_exact(xn2 @ p["w1"][l] + p["b1"][l])
        y = y @ p["w2"][l] + p["b2"][l]
        x = y + hh
    return _layer_norm(x, p["enc_g"][0], p["enc_b"][0])


# ------------------------------- main -----------------------------------------
if __name__ == "__main__":
    key = jax.random.PRNGKey(0)
    kx, kp = jax.random.split(key)
    x = jax.random.normal(kx, (BATCH, SEQ, HIDDEN), jnp.float32)
    params = init_params(kp)

    encoded, attn_weights = transformer_forward(x, params)
    encoded = jax.block_until_ready(encoded)

    ref = reference_forward(x, params)
    assert encoded.shape == (BATCH, SEQ, HIDDEN)
    assert attn_weights == []   # vis=False path
    assert jnp.allclose(encoded, ref, atol=1e-4, rtol=1e-4), "mismatch vs reference"

    print("KERNEL_OK")
</pallas_src>

<mosaic_0001>
module attributes {stable_mosaic.version = 11 : i64} {
  func.func @fused_encoder_kernel(%arg0: memref<16x32xf32, #tpu.memory_space<vmem>>, %arg1: memref<2x2x32xf32, #tpu.memory_space<vmem>>, %arg2: memref<2x2x32xf32, #tpu.memory_space<vmem>>, %arg3: memref<2x32x96xf32, #tpu.memory_space<vmem>>, %arg4: memref<2x96xf32, #tpu.memory_space<vmem>>, %arg5: memref<2x32x32xf32, #tpu.memory_space<vmem>>, %arg6: memref<2x32xf32, #tpu.memory_space<vmem>>, %arg7: memref<2x32x64xf32, #tpu.memory_space<vmem>>, %arg8: memref<2x64xf32, #tpu.memory_space<vmem>>, %arg9: memref<2x64x32xf32, #tpu.memory_space<vmem>>, %arg10: memref<2x32xf32, #tpu.memory_space<vmem>>, %arg11: memref<1x32xf32, #tpu.memory_space<vmem>>, %arg12: memref<1x32xf32, #tpu.memory_space<vmem>>, %arg13: memref<16x32xf32, #tpu.memory_space<vmem>>) attributes {dimension_semantics = [], scalar_prefetch = 0 : i64, scratch_operands = 0 : i64, tpu.core_type = #tpu.core_type<tc>} {
    %c0 = arith.constant 0 : index
    %c0_0 = arith.constant 0 : index
    %0 = vector.load %arg0[%c0, %c0_0] : memref<16x32xf32, #tpu.memory_space<vmem>>, vector<16x32xf32>
    %c0_1 = arith.constant 0 : index
    %c0_2 = arith.constant 0 : index
    %c0_3 = arith.constant 0 : index
    %1 = vector.load %arg1[%c0_1, %c0_2, %c0_3] : memref<2x2x32xf32, #tpu.memory_space<vmem>>, vector<2x2x32xf32>
    %c0_4 = arith.constant 0 : index
    %c0_5 = arith.constant 0 : index
    %c0_6 = arith.constant 0 : index
    %2 = vector.load %arg2[%c0_4, %c0_5, %c0_6] : memref<2x2x32xf32, #tpu.memory_space<vmem>>, vector<2x2x32xf32>
    %c0_7 = arith.constant 0 : index
    %c0_8 = arith.constant 0 : index
    %c0_9 = arith.constant 0 : index
    %3 = vector.load %arg3[%c0_7, %c0_8, %c0_9] : memref<2x32x96xf32, #tpu.memory_space<vmem>>, vector<2x32x96xf32>
    %c0_10 = arith.constant 0 : index
    %c0_11 = arith.constant 0 : index
    %4 = vector.load %arg4[%c0_10, %c0_11] : memref<2x96xf32, #tpu.memory_space<vmem>>, vector<2x96xf32>
    %c0_12 = arith.constant 0 : index
    %c0_13 = arith.constant 0 : index
    %c0_14 = arith.constant 0 : index
    %5 = vector.load %arg5[%c0_12, %c0_13, %c0_14] : memref<2x32x32xf32, #tpu.memory_space<vmem>>, vector<2x32x32xf32>
    %c0_15 = arith.constant 0 : index
    %c0_16 = arith.constant 0 : index
    %6 = vector.load %arg6[%c0_15, %c0_16] : memref<2x32xf32, #tpu.memory_space<vmem>>, vector<2x32xf32>
    %c0_17 = arith.constant 0 : index
    %c0_18 = arith.constant 0 : index
    %c0_19 = arith.constant 0 : index
    %7 = vector.load %arg7[%c0_17, %c0_18, %c0_19] : memref<2x32x64xf32, #tpu.memory_space<vmem>>, vector<2x32x64xf32>
    %c0_20 = arith.constant 0 : index
    %c0_21 = arith.constant 0 : index
    %8 = vector.load %arg8[%c0_20, %c0_21] : memref<2x64xf32, #tpu.memory_space<vmem>>, vector<2x64xf32>
    %c0_22 = arith.constant 0 : index
    %c0_23 = arith.constant 0 : index
    %c0_24 = arith.constant 0 : index
    %9 = vector.load %arg9[%c0_22, %c0_23, %c0_24] : memref<2x64x32xf32, #tpu.memory_space<vmem>>, vector<2x64x32xf32>
    %c0_25 = arith.constant 0 : index
    %c0_26 = arith.constant 0 : index
    %10 = vector.load %arg10[%c0_25, %c0_26] : memref<2x32xf32, #tpu.memory_space<vmem>>, vector<2x32xf32>
    %11 = vector.extract_strided_slice %1 {offsets = [0, 0, 0], sizes = [1, 1, 32], strides = [1, 1, 1]} : vector<2x2x32xf32> to vector<1x1x32xf32>
    %12 = vector.shape_cast %11 : vector<1x1x32xf32> to vector<32xf32>
    %13 = vector.extract_strided_slice %2 {offsets = [0, 0, 0], sizes = [1, 1, 32], strides = [1, 1, 1]} : vector<2x2x32xf32> to vector<1x1x32xf32>
    %14 = vector.shape_cast %13 : vector<1x1x32xf32> to vector<32xf32>
    %cst = arith.constant dense<0.000000e+00> : vector<16xf32>
    %15 = vector.multi_reduction <add>, %0, %cst [1] : vector<16x32xf32> to vector<16xf32>
    %16 = vector.shape_cast %15 : vector<16xf32> to vector<16x1xf32>
    %cst_27 = arith.constant 3.200000e+01 : f32
    %17 = vector.broadcast %cst_27 : f32 to vector<16x1xf32>
    %18 = arith.divf %16, %17 : vector<16x1xf32>
    %19 = vector.broadcast %18 : vector<16x1xf32> to vector<16x32xf32>
    %20 = arith.subf %0, %19 : vector<16x32xf32>
    %21 = arith.mulf %20, %20 : vector<16x32xf32>
    %cst_28 = arith.constant dense<0.000000e+00> : vector<16xf32>
    %22 = vector.multi_reduction <add>, %21, %cst_28 [1] : vector<16x32xf32> to vector<16xf32>
    %23 = vector.shape_cast %22 : vector<16xf32> to vector<16x1xf32>
    %cst_29 = arith.constant 3.200000e+01 : f32
    %24 = vector.broadcast %cst_29 : f32 to vector<16x1xf32>
    %25 = arith.divf %23, %24 : vector<16x1xf32>
    %26 = vector.broadcast %18 : vector<16x1xf32> to vector<16x32xf32>
    %27 = arith.subf %0, %26 : vector<16x32xf32>
    %cst_30 = arith.constant 9.99999997E-7 : f32
    %28 = vector.broadcast %cst_30 : f32 to vector<16x1xf32>
    %29 = arith.addf %25, %28 : vector<16x1xf32>
    %30 = math.rsqrt %29 : vector<16x1xf32>
    %31 = vector.broadcast %30 : vector<16x1xf32> to vector<16x32xf32>
    %32 = arith.mulf %27, %31 : vector<16x32xf32>
    %33 = vector.shape_cast %12 : vector<32xf32> to vector<1x32xf32>
    %34 = vector.broadcast %33 : vector<1x32xf32> to vector<16x32xf32>
    %35 = arith.mulf %32, %34 : vector<16x32xf32>
    %36 = vector.shape_cast %14 : vector<32xf32> to vector<1x32xf32>
    %37 = vector.broadcast %36 : vector<1x32xf32> to vector<16x32xf32>
    %38 = arith.addf %35, %37 : vector<16x32xf32>
    %39 = vector.extract_strided_slice %3 {offsets = [0, 0, 0], sizes = [1, 32, 96], strides = [1, 1, 1]} : vector<2x32x96xf32> to vector<1x32x96xf32>
    %40 = vector.shape_cast %39 : vector<1x32x96xf32> to vector<32x96xf32>
    %cst_31 = arith.constant dense<0.000000e+00> : vector<16x96xf32>
    %41 = tpu.matmul %38, %40, %cst_31 {dimension_numbers = #tpu.dot_dimension_numbers<[1], [0], [0], [1], [0, 0, 1, 1], [], []>} : vector<16x32xf32>, vector<32x96xf32>, vector<16x96xf32> -> vector<16x96xf32>
    %42 = vector.extract_strided_slice %4 {offsets = [0, 0], sizes = [1, 96], strides = [1, 1]} : vector<2x96xf32> to vector<1x96xf32>
    %43 = vector.shape_cast %42 : vector<1x96xf32> to vector<96xf32>
    %44 = vector.shape_cast %43 : vector<96xf32> to vector<1x96xf32>
    %45 = vector.broadcast %44 : vector<1x96xf32> to vector<16x96xf32>
    %46 = arith.addf %41, %45 : vector<16x96xf32>
    %47 = vector.extract_strided_slice %46 {offsets = [0, 0], sizes = [16, 32], strides = [1, 1]} : vector<16x96xf32> to vector<16x32xf32>
    %48 = vector.shape_cast %47 : vector<16x32xf32> to vector<2x8x32xf32>
    %49 = vector.extract_strided_slice %46 {offsets = [0, 32], sizes = [16, 32], strides = [1, 1]} : vector<16x96xf32> to vector<16x32xf32>
    %50 = vector.shape_cast %49 : vector<16x32xf32> to vector<2x8x32xf32>
    %51 = vector.extract_strided_slice %46 {offsets = [0, 64], sizes = [16, 32], strides = [1, 1]} : vector<16x96xf32> to vector<16x32xf32>
    %52 = vector.shape_cast %51 : vector<16x32xf32> to vector<2x8x32xf32>
    %53 = vector.extract_strided_slice %48 {offsets = [0, 0, 0], sizes = [2, 8, 8], strides = [1, 1, 1]} : vector<2x8x32xf32> to vector<2x8x8xf32>
    %54 = vector.extract_strided_slice %50 {offsets = [0, 0, 0], sizes = [2, 8, 8], strides = [1, 1, 1]} : vector<2x8x32xf32> to vector<2x8x8xf32>
    %55 = vector.extract_strided_slice %52 {offsets = [0, 0, 0], sizes = [2, 8, 8], strides = [1, 1, 1]} : vector<2x8x32xf32> to vector<2x8x8xf32>
    "tpu.trace_start"() <{level = 10 : i32, message = "bqd,bkd->bqk"}> : () -> ()
    %cst_32 = arith.constant dense<0.000000e+00> : vector<2x8x8xf32>
    %56 = tpu.matmul %53, %54, %cst_32 {dimension_numbers = #tpu.dot_dimension_numbers<[2], [2], [1], [1], [0, 0, 0, 1, 1, 1], [0], [0]>} : vector<2x8x8xf32>, vector<2x8x8xf32>, vector<2x8x8xf32> -> vector<2x8x8xf32>
    "tpu.trace_stop"() : () -> ()
    %cst_33 = arith.constant 0.353553385 : f32
    %57 = vector.broadcast %cst_33 : f32 to vector<2x8x8xf32>
    %58 = arith.mulf %56, %57 : vector<2x8x8xf32>
    %cst_34 = arith.constant dense<0xFF800000> : vector<2x8xf32>
    %59 = vector.multi_reduction <maximumf>, %58, %cst_34 [2] : vector<2x8x8xf32> to vector<2x8xf32>
    %60 = vector.shape_cast %59 : vector<2x8xf32> to vector<2x8x1xf32>
    %61 = vector.broadcast %60 : vector<2x8x1xf32> to vector<2x8x8xf32>
    %62 = arith.subf %58, %61 : vector<2x8x8xf32>
    %63 = math.exp %62 : vector<2x8x8xf32>
    %cst_35 = arith.constant dense<0.000000e+00> : vector<2x8xf32>
    %64 = vector.multi_reduction <add>, %63, %cst_35 [2] : vector<2x8x8xf32> to vector<2x8xf32>
    %65 = vector.shape_cast %64 : vector<2x8xf32> to vector<2x8x1xf32>
    %66 = tpu.reciprocal %65 : vector<2x8x1xf32> -> vector<2x8x1xf32>
    %67 = vector.broadcast %66 : vector<2x8x1xf32> to vector<2x8x8xf32>
    %68 = arith.mulf %63, %67 : vector<2x8x8xf32>
    "tpu.trace_start"() <{level = 10 : i32, message = "bqk,bkd->bqd"}> : () -> ()
    %cst_36 = arith.constant dense<0.000000e+00> : vector<2x8x8xf32>
    %69 = tpu.matmul %68, %55, %cst_36 {dimension_numbers = #tpu.dot_dimension_numbers<[2], [1], [1], [2], [0, 0, 0, 1, 1, 2], [0], [0]>} : vector<2x8x8xf32>, vector<2x8x8xf32>, vector<2x8x8xf32> -> vector<2x8x8xf32>
    "tpu.trace_stop"() : () -> ()
    %70 = vector.extract_strided_slice %48 {offsets = [0, 0, 8], sizes = [2, 8, 8], strides = [1, 1, 1]} : vector<2x8x32xf32> to vector<2x8x8xf32>
    %71 = vector.extract_strided_slice %50 {offsets = [0, 0, 8], sizes = [2, 8, 8], strides = [1, 1, 1]} : vector<2x8x32xf32> to vector<2x8x8xf32>
    %72 = vector.extract_strided_slice %52 {offsets = [0, 0, 8], sizes = [2, 8, 8], strides = [1, 1, 1]} : vector<2x8x32xf32> to vector<2x8x8xf32>
    "tpu.trace_start"() <{level = 10 : i32, message = "bqd,bkd->bqk"}> : () -> ()
    %cst_37 = arith.constant dense<0.000000e+00> : vector<2x8x8xf32>
    %73 = tpu.matmul %70, %71, %cst_37 {dimension_numbers = #tpu.dot_dimension_numbers<[2], [2], [1], [1], [0, 0, 0, 1, 1, 1], [0], [0]>} : vector<2x8x8xf32>, vector<2x8x8xf32>, vector<2x8x8xf32> -> vector<2x8x8xf32>
    "tpu.trace_stop"() : () -> ()
    %cst_38 = arith.constant 0.353553385 : f32
    %74 = vector.broadcast %cst_38 : f32 to vector<2x8x8xf32>
    %75 = arith.mulf %73, %74 : vector<2x8x8xf32>
    %cst_39 = arith.constant dense<0xFF800000> : vector<2x8xf32>
    %76 = vector.multi_reduction <maximumf>, %75, %cst_39 [2] : vector<2x8x8xf32> to vector<2x8xf32>
    %77 = vector.shape_cast %76 : vector<2x8xf32> to vector<2x8x1xf32>
    %78 = vector.broadcast %77 : vector<2x8x1xf32> to vector<2x8x8xf32>
    %79 = arith.subf %75, %78 : vector<2x8x8xf32>
    %80 = math.exp %79 : vector<2x8x8xf32>
    %cst_40 = arith.constant dense<0.000000e+00> : vector<2x8xf32>
    %81 = vector.multi_reduction <add>, %80, %cst_40 [2] : vector<2x8x8xf32> to vector<2x8xf32>
    %82 = vector.shape_cast %81 : vector<2x8xf32> to vector<2x8x1xf32>
    %83 = tpu.reciprocal %82 : vector<2x8x1xf32> -> vector<2x8x1xf32>
    %84 = vector.broadcast %83 : vector<2x8x1xf32> to vector<2x8x8xf32>
    %85 = arith.mulf %80, %84 : vector<2x8x8xf32>
    "tpu.trace_start"() <{level = 10 : i32, message = "bqk,bkd->bqd"}> : () -> ()
    %cst_41 = arith.constant dense<0.000000e+00> : vector<2x8x8xf32>
    %86 = tpu.matmul %85, %72, %cst_41 {dimension_numbers = #tpu.dot_dimension_numbers<[2], [1], [1], [2], [0, 0, 0, 1, 1, 2], [0], [0]>} : vector<2x8x8xf32>, vector<2x8x8xf32>, vector<2x8x8xf32> -> vector<2x8x8xf32>
    "tpu.trace_stop"() : () -> ()
    %87 = vector.extract_strided_slice %48 {offsets = [0, 0, 16], sizes = [2, 8, 8], strides = [1, 1, 1]} : vector<2x8x32xf32> to vector<2x8x8xf32>
    %88 = vector.extract_strided_slice %50 {offsets = [0, 0, 16], sizes = [2, 8, 8], strides = [1, 1, 1]} : vector<2x8x32xf32> to vector<2x8x8xf32>
    %89 = vector.extract_strided_slice %52 {offsets = [0, 0, 16], sizes = [2, 8, 8], strides = [1, 1, 1]} : vector<2x8x32xf32> to vector<2x8x8xf32>
    "tpu.trace_start"() <{level = 10 : i32, message = "bqd,bkd->bqk"}> : () -> ()
    %cst_42 = arith.constant dense<0.000000e+00> : vector<2x8x8xf32>
    %90 = tpu.matmul %87, %88, %cst_42 {dimension_numbers = #tpu.dot_dimension_numbers<[2], [2], [1], [1], [0, 0, 0, 1, 1, 1], [0], [0]>} : vector<2x8x8xf32>, vector<2x8x8xf32>, vector<2x8x8xf32> -> vector<2x8x8xf32>
    "tpu.trace_stop"() : () -> ()
    %cst_43 = arith.constant 0.353553385 : f32
    %91 = vector.broadcast %cst_43 : f32 to vector<2x8x8xf32>
    %92 = arith.mulf %90, %91 : vector<2x8x8xf32>
    %cst_44 = arith.constant dense<0xFF800000> : vector<2x8xf32>
    %93 = vector.multi_reduction <maximumf>, %92, %cst_44 [2] : vector<2x8x8xf32> to vector<2x8xf32>
    %94 = vector.shape_cast %93 : vector<2x8xf32> to vector<2x8x1xf32>
    %95 = vector.broadcast %94 : vector<2x8x1xf32> to vector<2x8x8xf32>
    %96 = arith.subf %92, %95 : vector<2x8x8xf32>
    %97 = math.exp %96 : vector<2x8x8xf32>
    %cst_45 = arith.constant dense<0.000000e+00> : vector<2x8xf32>
    %98 = vector.multi_reduction <add>, %97, %cst_45 [2] : vector<2x8x8xf32> to vector<2x8xf32>
    %99 = vector.shape_cast %98 : vector<2x8xf32> to vector<2x8x1xf32>
    %100 = tpu.reciprocal %99 : vector<2x8x1xf32> -> vector<2x8x1xf32>
    %101 = vector.broadcast %100 : vector<2x8x1xf32> to vector<2x8x8xf32>
    %102 = arith.mulf %97, %101 : vector<2x8x8xf32>
    "tpu.trace_start"() <{level = 10 : i32, message = "bqk,bkd->bqd"}> : () -> ()
    %cst_46 = arith.constant dense<0.000000e+00> : vector<2x8x8xf32>
    %103 = tpu.matmul %102, %89, %cst_46 {dimension_numbers = #tpu.dot_dimension_numbers<[2], [1], [1], [2], [0, 0, 0, 1, 1, 2], [0], [0]>} : vector<2x8x8xf32>, vector<2x8x8xf32>, vector<2x8x8xf32> -> vector<2x8x8xf32>
    "tpu.trace_stop"() : () -> ()
    %104 = vector.extract_strided_slice %48 {offsets = [0, 0, 24], sizes = [2, 8, 8], strides = [1, 1, 1]} : vector<2x8x32xf32> to vector<2x8x8xf32>
    %105 = vector.extract_strided_slice %50 {offsets = [0, 0, 24], sizes = [2, 8, 8], strides = [1, 1, 1]} : vector<2x8x32xf32> to vector<2x8x8xf32>
    %106 = vector.extract_strided_slice %52 {offsets = [0, 0, 24], sizes = [2, 8, 8], strides = [1, 1, 1]} : vector<2x8x32xf32> to vector<2x8x8xf32>
    "tpu.trace_start"() <{level = 10 : i32, message = "bqd,bkd->bqk"}> : () -> ()
    %cst_47 = arith.constant dense<0.000000e+00> : vector<2x8x8xf32>
    %107 = tpu.matmul %104, %105, %cst_47 {dimension_numbers = #tpu.dot_dimension_numbers<[2], [2], [1], [1], [0, 0, 0, 1, 1, 1], [0], [0]>} : vector<2x8x8xf32>, vector<2x8x8xf32>, vector<2x8x8xf32> -> vector<2x8x8xf32>
    "tpu.trace_stop"() : () -> ()
    %cst_48 = arith.constant 0.353553385 : f32
    %108 = vector.broadcast %cst_48 : f32 to vector<2x8x8xf32>
    %109 = arith.mulf %107, %108 : vector<2x8x8xf32>
    %cst_49 = arith.constant dense<0xFF800000> : vector<2x8xf32>
    %110 = vector.multi_reduction <maximumf>, %109, %cst_49 [2] : vector<2x8x8xf32> to vector<2x8xf32>
    %111 = vector.shape_cast %110 : vector<2x8xf32> to vector<2x8x1xf32>
    %112 = vector.broadcast %111 : vector<2x8x1xf32> to vector<2x8x8xf32>
    %113 = arith.subf %109, %112 : vector<2x8x8xf32>
    %114 = math.exp %113 : vector<2x8x8xf32>
    %cst_50 = arith.constant dense<0.000000e+00> : vector<2x8xf32>
    %115 = vector.multi_reduction <add>, %114, %cst_50 [2] : vector<2x8x8xf32> to vector<2x8xf32>
    %116 = vector.shape_cast %115 : vector<2x8xf32> to vector<2x8x1xf32>
    %117 = tpu.reciprocal %116 : vector<2x8x1xf32> -> vector<2x8x1xf32>
    %118 = vector.broadcast %117 : vector<2x8x1xf32> to vector<2x8x8xf32>
    %119 = arith.mulf %114, %118 : vector<2x8x8xf32>
    "tpu.trace_start"() <{level = 10 : i32, message = "bqk,bkd->bqd"}> : () -> ()
    %cst_51 = arith.constant dense<0.000000e+00> : vector<2x8x8xf32>
    %120 = tpu.matmul %119, %106, %cst_51 {dimension_numbers = #tpu.dot_dimension_numbers<[2], [1], [1], [2], [0, 0, 0, 1, 1, 2], [0], [0]>} : vector<2x8x8xf32>, vector<2x8x8xf32>, vector<2x8x8xf32> -> vector<2x8x8xf32>
    "tpu.trace_stop"() : () -> ()
    %121 = tpu.concatenate %69, %86, %103, %120 in 2 : vector<2x8x8xf32>, vector<2x8x8xf32>, vector<2x8x8xf32>, vector<2x8x8xf32> -> vector<2x8x32xf32>
    %122 = vector.shape_cast %121 : vector<2x8x32xf32> to vector<16x32xf32>
    %123 = vector.extract_strided_slice %5 {offsets = [0, 0, 0], sizes = [1, 32, 32], strides = [1, 1, 1]} : vector<2x32x32xf32> to vector<1x32x32xf32>
    %124 = vector.shape_cast %123 : vector<1x32x32xf32> to vector<32x32xf32>
    %cst_52 = arith.constant dense<0.000000e+00> : vector<16x32xf32>
    %125 = tpu.matmul %122, %124, %cst_52 {dimension_numbers = #tpu.dot_dimension_numbers<[1], [0], [0], [1], [0, 0, 1, 1], [], []>} : vector<16x32xf32>, vector<32x32xf32>, vector<16x32xf32> -> vector<16x32xf32>
    %126 = vector.extract_strided_slice %6 {offsets = [0, 0], sizes = [1, 32], strides = [1, 1]} : vector<2x32xf32> to vector<1x32xf32>
    %127 = vector.shape_cast %126 : vector<1x32xf32> to vector<32xf32>
    %128 = vector.shape_cast %127 : vector<32xf32> to vector<1x32xf32>
    %129 = vector.broadcast %128 : vector<1x32xf32> to vector<16x32xf32>
    %130 = arith.addf %125, %129 : vector<16x32xf32>
    %131 = arith.addf %130, %0 : vector<16x32xf32>
    %132 = vector.extract_strided_slice %1 {offsets = [0, 1, 0], sizes = [1, 1, 32], strides = [1, 1, 1]} : vector<2x2x32xf32> to vector<1x1x32xf32>
    %133 = vector.shape_cast %132 : vector<1x1x32xf32> to vector<32xf32>
    %134 = vector.extract_strided_slice %2 {offsets = [0, 1, 0], sizes = [1, 1, 32], strides = [1, 1, 1]} : vector<2x2x32xf32> to vector<1x1x32xf32>
    %135 = vector.shape_cast %134 : vector<1x1x32xf32> to vector<32xf32>
    %cst_53 = arith.constant dense<0.000000e+00> : vector<16xf32>
    %136 = vector.multi_reduction <add>, %131, %cst_53 [1] : vector<16x32xf32> to vector<16xf32>
    %137 = vector.shape_cast %136 : vector<16xf32> to vector<16x1xf32>
    %cst_54 = arith.constant 3.200000e+01 : f32
    %138 = vector.broadcast %cst_54 : f32 to vector<16x1xf32>
    %139 = arith.divf %137, %138 : vector<16x1xf32>
    %140 = vector.broadcast %139 : vector<16x1xf32> to vector<16x32xf32>
    %141 = arith.subf %131, %140 : vector<16x32xf32>
    %142 = arith.mulf %141, %141 : vector<16x32xf32>
    %cst_55 = arith.constant dense<0.000000e+00> : vector<16xf32>
    %143 = vector.multi_reduction <add>, %142, %cst_55 [1] : vector<16x32xf32> to vector<16xf32>
    %144 = vector.shape_cast %143 : vector<16xf32> to vector<16x1xf32>
    %cst_56 = arith.constant 3.200000e+01 : f32
    %145 = vector.broadcast %cst_56 : f32 to vector<16x1xf32>
    %146 = arith.divf %144, %145 : vector<16x1xf32>
    %147 = vector.broadcast %139 : vector<16x1xf32> to vector<16x32xf32>
    %148 = arith.subf %131, %147 : vector<16x32xf32>
    %cst_57 = arith.constant 9.99999997E-7 : f32
    %149 = vector.broadcast %cst_57 : f32 to vector<16x1xf32>
    %150 = arith.addf %146, %149 : vector<16x1xf32>
    %151 = math.rsqrt %150 : vector<16x1xf32>
    %152 = vector.broadcast %151 : vector<16x1xf32> to vector<16x32xf32>
    %153 = arith.mulf %148, %152 : vector<16x32xf32>
    %154 = vector.shape_cast %133 : vector<32xf32> to vector<1x32xf32>
    %155 = vector.broadcast %154 : vector<1x32xf32> to vector<16x32xf32>
    %156 = arith.mulf %153, %155 : vector<16x32xf32>
    %157 = vector.shape_cast %135 : vector<32xf32> to vector<1x32xf32>
    %158 = vector.broadcast %157 : vector<1x32xf32> to vector<16x32xf32>
    %159 = arith.addf %156, %158 : vector<16x32xf32>
    %160 = vector.extract_strided_slice %7 {offsets = [0, 0, 0], sizes = [1, 32, 64], strides = [1, 1, 1]} : vector<2x32x64xf32> to vector<1x32x64xf32>
    %161 = vector.shape_cast %160 : vector<1x32x64xf32> to vector<32x64xf32>
    %cst_58 = arith.constant dense<0.000000e+00> : vector<16x64xf32>
    %162 = tpu.matmul %159, %161, %cst_58 {dimension_numbers = #tpu.dot_dimension_numbers<[1], [0], [0], [1], [0, 0, 1, 1], [], []>} : vector<16x32xf32>, vector<32x64xf32>, vector<16x64xf32> -> vector<16x64xf32>
    %163 = vector.extract_strided_slice %8 {offsets = [0, 0], sizes = [1, 64], strides = [1, 1]} : vector<2x64xf32> to vector<1x64xf32>
    %164 = vector.shape_cast %163 : vector<1x64xf32> to vector<64xf32>
    %165 = vector.shape_cast %164 : vector<64xf32> to vector<1x64xf32>
    %166 = vector.broadcast %165 : vector<1x64xf32> to vector<16x64xf32>
    %167 = arith.addf %162, %166 : vector<16x64xf32>
    %cst_59 = arith.constant 5.000000e-01 : f32
    %168 = vector.broadcast %cst_59 : f32 to vector<16x64xf32>
    %169 = arith.mulf %168, %167 : vector<16x64xf32>
    %cst_60 = arith.constant 2.000000e+00 : f32
    %170 = math.sqrt %cst_60 : f32
    %171 = vector.broadcast %170 : f32 to vector<16x64xf32>
    %172 = arith.divf %167, %171 : vector<16x64xf32>
    %173 = math.erf %172 : vector<16x64xf32>
    %cst_61 = arith.constant 1.000000e+00 : f32
    %174 = vector.broadcast %cst_61 : f32 to vector<16x64xf32>
    %175 = arith.addf %174, %173 : vector<16x64xf32>
    %176 = arith.mulf %169, %175 : vector<16x64xf32>
    %177 = vector.extract_strided_slice %9 {offsets = [0, 0, 0], sizes = [1, 64, 32], strides = [1, 1, 1]} : vector<2x64x32xf32> to vector<1x64x32xf32>
    %178 = vector.shape_cast %177 : vector<1x64x32xf32> to vector<64x32xf32>
    %cst_62 = arith.constant dense<0.000000e+00> : vector<16x32xf32>
    %179 = tpu.matmul %176, %178, %cst_62 {dimension_numbers = #tpu.dot_dimension_numbers<[1], [0], [0], [1], [0, 0, 1, 1], [], []>} : vector<16x64xf32>, vector<64x32xf32>, vector<16x32xf32> -> vector<16x32xf32>
    %180 = vector.extract_strided_slice %10 {offsets = [0, 0], sizes = [1, 32], strides = [1, 1]} : vector<2x32xf32> to vector<1x32xf32>
    %181 = vector.shape_cast %180 : vector<1x32xf32> to vector<32xf32>
    %182 = vector.shape_cast %181 : vector<32xf32> to vector<1x32xf32>
    %183 = vector.broadcast %182 : vector<1x32xf32> to vector<16x32xf32>
    %184 = arith.addf %179, %183 : vector<16x32xf32>
    %185 = arith.addf %184, %131 : vector<16x32xf32>
    %186 = vector.extract_strided_slice %1 {offsets = [1, 0, 0], sizes = [1, 1, 32], strides = [1, 1, 1]} : vector<2x2x32xf32> to vector<1x1x32xf32>
    %187 = vector.shape_cast %186 : vector<1x1x32xf32> to vector<32xf32>
    %188 = vector.extract_strided_slice %2 {offsets = [1, 0, 0], sizes = [1, 1, 32], strides = [1, 1, 1]} : vector<2x2x32xf32> to vector<1x1x32xf32>
    %189 = vector.shape_cast %188 : vector<1x1x32xf32> to vector<32xf32>
    %cst_63 = arith.constant dense<0.000000e+00> : vector<16xf32>
    %190 = vector.multi_reduction <add>, %185, %cst_63 [1] : vector<16x32xf32> to vector<16xf32>
    %191 = vector.shape_cast %190 : vector<16xf32> to vector<16x1xf32>
    %cst_64 = arith.constant 3.200000e+01 : f32
    %192 = vector.broadcast %cst_64 : f32 to vector<16x1xf32>
    %193 = arith.divf %191, %192 : vector<16x1xf32>
    %194 = vector.broadcast %193 : vector<16x1xf32> to vector<16x32xf32>
    %195 = arith.subf %185, %194 : vector<16x32xf32>
    %196 = arith.mulf %195, %195 : vector<16x32xf32>
    %cst_65 = arith.constant dense<0.000000e+00> : vector<16xf32>
    %197 = vector.multi_reduction <add>, %196, %cst_65 [1] : vector<16x32xf32> to vector<16xf32>
    %198 = vector.shape_cast %197 : vector<16xf32> to vector<16x1xf32>
    %cst_66 = arith.constant 3.200000e+01 : f32
    %199 = vector.broadcast %cst_66 : f32 to vector<16x1xf32>
    %200 = arith.divf %198, %199 : vector<16x1xf32>
    %201 = vector.broadcast %193 : vector<16x1xf32> to vector<16x32xf32>
    %202 = arith.subf %185, %201 : vector<16x32xf32>
    %cst_67 = arith.constant 9.99999997E-7 : f32
    %203 = vector.broadcast %cst_67 : f32 to vector<16x1xf32>
    %204 = arith.addf %200, %203 : vector<16x1xf32>
    %205 = math.rsqrt %204 : vector<16x1xf32>
    %206 = vector.broadcast %205 : vector<16x1xf32> to vector<16x32xf32>
    %207 = arith.mulf %202, %206 : vector<16x32xf32>
    %208 = vector.shape_cast %187 : vector<32xf32> to vector<1x32xf32>
    %209 = vector.broadcast %208 : vector<1x32xf32> to vector<16x32xf32>
    %210 = arith.mulf %207, %209 : vector<16x32xf32>
    %211 = vector.shape_cast %189 : vector<32xf32> to vector<1x32xf32>
    %212 = vector.broadcast %211 : vector<1x32xf32> to vector<16x32xf32>
    %213 = arith.addf %210, %212 : vector<16x32xf32>
    %214 = vector.extract_strided_slice %3 {offsets = [1, 0, 0], sizes = [1, 32, 96], strides = [1, 1, 1]} : vector<2x32x96xf32> to vector<1x32x96xf32>
    %215 = vector.shape_cast %214 : vector<1x32x96xf32> to vector<32x96xf32>
    %cst_68 = arith.constant dense<0.000000e+00> : vector<16x96xf32>
    %216 = tpu.matmul %213, %215, %cst_68 {dimension_numbers = #tpu.dot_dimension_numbers<[1], [0], [0], [1], [0, 0, 1, 1], [], []>} : vector<16x32xf32>, vector<32x96xf32>, vector<16x96xf32> -> vector<16x96xf32>
    %217 = vector.extract_strided_slice %4 {offsets = [1, 0], sizes = [1, 96], strides = [1, 1]} : vector<2x96xf32> to vector<1x96xf32>
    %218 = vector.shape_cast %217 : vector<1x96xf32> to vector<96xf32>
    %219 = vector.shape_cast %218 : vector<96xf32> to vector<1x96xf32>
    %220 = vector.broadcast %219 : vector<1x96xf32> to vector<16x96xf32>
    %221 = arith.addf %216, %220 : vector<16x96xf32>
    %222 = vector.extract_strided_slice %221 {offsets = [0, 0], sizes = [16, 32], strides = [1, 1]} : vector<16x96xf32> to vector<16x32xf32>
    %223 = vector.shape_cast %222 : vector<16x32xf32> to vector<2x8x32xf32>
    %224 = vector.extract_strided_slice %221 {offsets = [0, 32], sizes = [16, 32], strides = [1, 1]} : vector<16x96xf32> to vector<16x32xf32>
    %225 = vector.shape_cast %224 : vector<16x32xf32> to vector<2x8x32xf32>
    %226 = vector.extract_strided_slice %221 {offsets = [0, 64], sizes = [16, 32], strides = [1, 1]} : vector<16x96xf32> to vector<16x32xf32>
    %227 = vector.shape_cast %226 : vector<16x32xf32> to vector<2x8x32xf32>
    %228 = vector.extract_strided_slice %223 {offsets = [0, 0, 0], sizes = [2, 8, 8], strides = [1, 1, 1]} : vector<2x8x32xf32> to vector<2x8x8xf32>
    %229 = vector.extract_strided_slice %225 {offsets = [0, 0, 0], sizes = [2, 8, 8], strides = [1, 1, 1]} : vector<2x8x32xf32> to vector<2x8x8xf32>
    %230 = vector.extract_strided_slice %227 {offsets = [0, 0, 0], sizes = [2, 8, 8], strides = [1, 1, 1]} : vector<2x8x32xf32> to vector<2x8x8xf32>
    "tpu.trace_start"() <{level = 10 : i32, message = "bqd,bkd->bqk"}> : () -> ()
    %cst_69 = arith.constant dense<0.000000e+00> : vector<2x8x8xf32>
    %231 = tpu.matmul %228, %229, %cst_69 {dimension_numbers = #tpu.dot_dimension_numbers<[2], [2], [1], [1], [0, 0, 0, 1, 1, 1], [0], [0]>} : vector<2x8x8xf32>, vector<2x8x8xf32>, vector<2x8x8xf32> -> vector<2x8x8xf32>
    "tpu.trace_stop"() : () -> ()
    %cst_70 = arith.constant 0.353553385 : f32
    %232 = vector.broadcast %cst_70 : f32 to vector<2x8x8xf32>
    %233 = arith.mulf %231, %232 : vector<2x8x8xf32>
    %cst_71 = arith.constant dense<0xFF800000> : vector<2x8xf32>
    %234 = vector.multi_reduction <maximumf>, %233, %cst_71 [2] : vector<2x8x8xf32> to vector<2x8xf32>
    %235 = vector.shape_cast %234 : vector<2x8xf32> to vector<2x8x1xf32>
    %236 = vector.broadcast %235 : vector<2x8x1xf32> to vector<2x8x8xf32>
    %237 = arith.subf %233, %236 : vector<2x8x8xf32>
    %238 = math.exp %237 : vector<2x8x8xf32>
    %cst_72 = arith.constant dense<0.000000e+00> : vector<2x8xf32>
    %239 = vector.multi_reduction <add>, %238, %cst_72 [2] : vector<2x8x8xf32> to vector<2x8xf32>
    %240 = vector.shape_cast %239 : vector<2x8xf32> to vector<2x8x1xf32>
    %241 = tpu.reciprocal %240 : vector<2x8x1xf32> -> vector<2x8x1xf32>
    %242 = vector.broadcast %241 : vector<2x8x1xf32> to vector<2x8x8xf32>
    %243 = arith.mulf %238, %242 : vector<2x8x8xf32>
    "tpu.trace_start"() <{level = 10 : i32, message = "bqk,bkd->bqd"}> : () -> ()
    %cst_73 = arith.constant dense<0.000000e+00> : vector<2x8x8xf32>
    %244 = tpu.matmul %243, %230, %cst_73 {dimension_numbers = #tpu.dot_dimension_numbers<[2], [1], [1], [2], [0, 0, 0, 1, 1, 2], [0], [0]>} : vector<2x8x8xf32>, vector<2x8x8xf32>, vector<2x8x8xf32> -> vector<2x8x8xf32>
    "tpu.trace_stop"() : () -> ()
    %245 = vector.extract_strided_slice %223 {offsets = [0, 0, 8], sizes = [2, 8, 8], strides = [1, 1, 1]} : vector<2x8x32xf32> to vector<2x8x8xf32>
    %246 = vector.extract_strided_slice %225 {offsets = [0, 0, 8], sizes = [2, 8, 8], strides = [1, 1, 1]} : vector<2x8x32xf32> to vector<2x8x8xf32>
    %247 = vector.extract_strided_slice %227 {offsets = [0, 0, 8], sizes = [2, 8, 8], strides = [1, 1, 1]} : vector<2x8x32xf32> to vector<2x8x8xf32>
    "tpu.trace_start"() <{level = 10 : i32, message = "bqd,bkd->bqk"}> : () -> ()
    %cst_74 = arith.constant dense<0.000000e+00> : vector<2x8x8xf32>
    %248 = tpu.matmul %245, %246, %cst_74 {dimension_numbers = #tpu.dot_dimension_numbers<[2], [2], [1], [1], [0, 0, 0, 1, 1, 1], [0], [0]>} : vector<2x8x8xf32>, vector<2x8x8xf32>, vector<2x8x8xf32> -> vector<2x8x8xf32>
    "tpu.trace_stop"() : () -> ()
    %cst_75 = arith.constant 0.353553385 : f32
    %249 = vector.broadcast %cst_75 : f32 to vector<2x8x8xf32>
    %250 = arith.mulf %248, %249 : vector<2x8x8xf32>
    %cst_76 = arith.constant dense<0xFF800000> : vector<2x8xf32>
    %251 = vector.multi_reduction <maximumf>, %250, %cst_76 [2] : vector<2x8x8xf32> to vector<2x8xf32>
    %252 = vector.shape_cast %251 : vector<2x8xf32> to vector<2x8x1xf32>
    %253 = vector.broadcast %252 : vector<2x8x1xf32> to vector<2x8x8xf32>
    %254 = arith.subf %250, %253 : vector<2x8x8xf32>
    %255 = math.exp %254 : vector<2x8x8xf32>
    %cst_77 = arith.constant dense<0.000000e+00> : vector<2x8xf32>
    %256 = vector.multi_reduction <add>, %255, %cst_77 [2] : vector<2x8x8xf32> to vector<2x8xf32>
    %257 = vector.shape_cast %256 : vector<2x8xf32> to vector<2x8x1xf32>
    %258 = tpu.reciprocal %257 : vector<2x8x1xf32> -> vector<2x8x1xf32>
    %259 = vector.broadcast %258 : vector<2x8x1xf32> to vector<2x8x8xf32>
    %260 = arith.mulf %255, %259 : vector<2x8x8xf32>
    "tpu.trace_start"() <{level = 10 : i32, message = "bqk,bkd->bqd"}> : () -> ()
    %cst_78 = arith.constant dense<0.000000e+00> : vector<2x8x8xf32>
    %261 = tpu.matmul %260, %247, %cst_78 {dimension_numbers = #tpu.dot_dimension_numbers<[2], [1], [1], [2], [0, 0, 0, 1, 1, 2], [0], [0]>} : vector<2x8x8xf32>, vector<2x8x8xf32>, vector<2x8x8xf32> -> vector<2x8x8xf32>
    "tpu.trace_stop"() : () -> ()
    %262 = vector.extract_strided_slice %223 {offsets = [0, 0, 16], sizes = [2, 8, 8], strides = [1, 1, 1]} : vector<2x8x32xf32> to vector<2x8x8xf32>
    %263 = vector.extract_strided_slice %225 {offsets = [0, 0, 16], sizes = [2, 8, 8], strides = [1, 1, 1]} : vector<2x8x32xf32> to vector<2x8x8xf32>
    %264 = vector.extract_strided_slice %227 {offsets = [0, 0, 16], sizes = [2, 8, 8], strides = [1, 1, 1]} : vector<2x8x32xf32> to vector<2x8x8xf32>
    "tpu.trace_start"() <{level = 10 : i32, message = "bqd,bkd->bqk"}> : () -> ()
    %cst_79 = arith.constant dense<0.000000e+00> : vector<2x8x8xf32>
    %265 = tpu.matmul %262, %263, %cst_79 {dimension_numbers = #tpu.dot_dimension_numbers<[2], [2], [1], [1], [0, 0, 0, 1, 1, 1], [0], [0]>} : vector<2x8x8xf32>, vector<2x8x8xf32>, vector<2x8x8xf32> -> vector<2x8x8xf32>
    "tpu.trace_stop"() : () -> ()
    %cst_80 = arith.constant 0.353553385 : f32
    %266 = vector.broadcast %cst_80 : f32 to vector<2x8x8xf32>
    %267 = arith.mulf %265, %266 : vector<2x8x8xf32>
    %cst_81 = arith.constant dense<0xFF800000> : vector<2x8xf32>
    %268 = vector.multi_reduction <maximumf>, %267, %cst_81 [2] : vector<2x8x8xf32> to vector<2x8xf32>
    %269 = vector.shape_cast %268 : vector<2x8xf32> to vector<2x8x1xf32>
    %270 = vector.broadcast %269 : vector<2x8x1xf32> to vector<2x8x8xf32>
    %271 = arith.subf %267, %270 : vector<2x8x8xf32>
    %272 = math.exp %271 : vector<2x8x8xf32>
    %cst_82 = arith.constant dense<0.000000e+00> : vector<2x8xf32>
    %273 = vector.multi_reduction <add>, %272, %cst_82 [2] : vector<2x8x8xf32> to vector<2x8xf32>
    %274 = vector.shape_cast %273 : vector<2x8xf32> to vector<2x8x1xf32>
    %275 = tpu.reciprocal %274 : vector<2x8x1xf32> -> vector<2x8x1xf32>
    %276 = vector.broadcast %275 : vector<2x8x1xf32> to vector<2x8x8xf32>
    %277 = arith.mulf %272, %276 : vector<2x8x8xf32>
    "tpu.trace_start"() <{level = 10 : i32, message = "bqk,bkd->bqd"}> : () -> ()
    %cst_83 = arith.constant dense<0.000000e+00> : vector<2x8x8xf32>
    %278 = tpu.matmul %277, %264, %cst_83 {dimension_numbers = #tpu.dot_dimension_numbers<[2], [1], [1], [2], [0, 0, 0, 1, 1, 2], [0], [0]>} : vector<2x8x8xf32>, vector<2x8x8xf32>, vector<2x8x8xf32> -> vector<2x8x8xf32>
    "tpu.trace_stop"() : () -> ()
    %279 = vector.extract_strided_slice %223 {offsets = [0, 0, 24], sizes = [2, 8, 8], strides = [1, 1, 1]} : vector<2x8x32xf32> to vector<2x8x8xf32>
    %280 = vector.extract_strided_slice %225 {offsets = [0, 0, 24], sizes = [2, 8, 8], strides = [1, 1, 1]} : vector<2x8x32xf32> to vector<2x8x8xf32>
    %281 = vector.extract_strided_slice %227 {offsets = [0, 0, 24], sizes = [2, 8, 8], strides = [1, 1, 1]} : vector<2x8x32xf32> to vector<2x8x8xf32>
    "tpu.trace_start"() <{level = 10 : i32, message = "bqd,bkd->bqk"}> : () -> ()
    %cst_84 = arith.constant dense<0.000000e+00> : vector<2x8x8xf32>
    %282 = tpu.matmul %279, %280, %cst_84 {dimension_numbers = #tpu.dot_dimension_numbers<[2], [2], [1], [1], [0, 0, 0, 1, 1, 1], [0], [0]>} : vector<2x8x8xf32>, vector<2x8x8xf32>, vector<2x8x8xf32> -> vector<2x8x8xf32>
    "tpu.trace_stop"() : () -> ()
    %cst_85 = arith.constant 0.353553385 : f32
    %283 = vector.broadcast %cst_85 : f32 to vector<2x8x8xf32>
    %284 = arith.mulf %282, %283 : vector<2x8x8xf32>
    %cst_86 = arith.constant dense<0xFF800000> : vector<2x8xf32>
    %285 = vector.multi_reduction <maximumf>, %284, %cst_86 [2] : vector<2x8x8xf32> to vector<2x8xf32>
    %286 = vector.shape_cast %285 : vector<2x8xf32> to vector<2x8x1xf32>
    %287 = vector.broadcast %286 : vector<2x8x1xf32> to vector<2x8x8xf32>
    %288 = arith.subf %284, %287 : vector<2x8x8xf32>
    %289 = math.exp %288 : vector<2x8x8xf32>
    %cst_87 = arith.constant dense<0.000000e+00> : vector<2x8xf32>
    %290 = vector.multi_reduction <add>, %289, %cst_87 [2] : vector<2x8x8xf32> to vector<2x8xf32>
    %291 = vector.shape_cast %290 : vector<2x8xf32> to vector<2x8x1xf32>
    %292 = tpu.reciprocal %291 : vector<2x8x1xf32> -> vector<2x8x1xf32>
    %293 = vector.broadcast %292 : vector<2x8x1xf32> to vector<2x8x8xf32>
    %294 = arith.mulf %289, %293 : vector<2x8x8xf32>
    "tpu.trace_start"() <{level = 10 : i32, message = "bqk,bkd->bqd"}> : () -> ()
    %cst_88 = arith.constant dense<0.000000e+00> : vector<2x8x8xf32>
    %295 = tpu.matmul %294, %281, %cst_88 {dimension_numbers = #tpu.dot_dimension_numbers<[2], [1], [1], [2], [0, 0, 0, 1, 1, 2], [0], [0]>} : vector<2x8x8xf32>, vector<2x8x8xf32>, vector<2x8x8xf32> -> vector<2x8x8xf32>
    "tpu.trace_stop"() : () -> ()
    %296 = tpu.concatenate %244, %261, %278, %295 in 2 : vector<2x8x8xf32>, vector<2x8x8xf32>, vector<2x8x8xf32>, vector<2x8x8xf32> -> vector<2x8x32xf32>
    %297 = vector.shape_cast %296 : vector<2x8x32xf32> to vector<16x32xf32>
    %298 = vector.extract_strided_slice %5 {offsets = [1, 0, 0], sizes = [1, 32, 32], strides = [1, 1, 1]} : vector<2x32x32xf32> to vector<1x32x32xf32>
    %299 = vector.shape_cast %298 : vector<1x32x32xf32> to vector<32x32xf32>
    %cst_89 = arith.constant dense<0.000000e+00> : vector<16x32xf32>
    %300 = tpu.matmul %297, %299, %cst_89 {dimension_numbers = #tpu.dot_dimension_numbers<[1], [0], [0], [1], [0, 0, 1, 1], [], []>} : vector<16x32xf32>, vector<32x32xf32>, vector<16x32xf32> -> vector<16x32xf32>
    %301 = vector.extract_strided_slice %6 {offsets = [1, 0], sizes = [1, 32], strides = [1, 1]} : vector<2x32xf32> to vector<1x32xf32>
    %302 = vector.shape_cast %301 : vector<1x32xf32> to vector<32xf32>
    %303 = vector.shape_cast %302 : vector<32xf32> to vector<1x32xf32>
    %304 = vector.broadcast %303 : vector<1x32xf32> to vector<16x32xf32>
    %305 = arith.addf %300, %304 : vector<16x32xf32>
    %306 = arith.addf %305, %185 : vector<16x32xf32>
    %307 = vector.extract_strided_slice %1 {offsets = [1, 1, 0], sizes = [1, 1, 32], strides = [1, 1, 1]} : vector<2x2x32xf32> to vector<1x1x32xf32>
    %308 = vector.shape_cast %307 : vector<1x1x32xf32> to vector<32xf32>
    %309 = vector.extract_strided_slice %2 {offsets = [1, 1, 0], sizes = [1, 1, 32], strides = [1, 1, 1]} : vector<2x2x32xf32> to vector<1x1x32xf32>
    %310 = vector.shape_cast %309 : vector<1x1x32xf32> to vector<32xf32>
    %cst_90 = arith.constant dense<0.000000e+00> : vector<16xf32>
    %311 = vector.multi_reduction <add>, %306, %cst_90 [1] : vector<16x32xf32> to vector<16xf32>
    %312 = vector.shape_cast %311 : vector<16xf32> to vector<16x1xf32>
    %cst_91 = arith.constant 3.200000e+01 : f32
    %313 = vector.broadcast %cst_91 : f32 to vector<16x1xf32>
    %314 = arith.divf %312, %313 : vector<16x1xf32>
    %315 = vector.broadcast %314 : vector<16x1xf32> to vector<16x32xf32>
    %316 = arith.subf %306, %315 : vector<16x32xf32>
    %317 = arith.mulf %316, %316 : vector<16x32xf32>
    %cst_92 = arith.constant dense<0.000000e+00> : vector<16xf32>
    %318 = vector.multi_reduction <add>, %317, %cst_92 [1] : vector<16x32xf32> to vector<16xf32>
    %319 = vector.shape_cast %318 : vector<16xf32> to vector<16x1xf32>
    %cst_93 = arith.constant 3.200000e+01 : f32
    %320 = vector.broadcast %cst_93 : f32 to vector<16x1xf32>
    %321 = arith.divf %319, %320 : vector<16x1xf32>
    %322 = vector.broadcast %314 : vector<16x1xf32> to vector<16x32xf32>
    %323 = arith.subf %306, %322 : vector<16x32xf32>
    %cst_94 = arith.constant 9.99999997E-7 : f32
    %324 = vector.broadcast %cst_94 : f32 to vector<16x1xf32>
    %325 = arith.addf %321, %324 : vector<16x1xf32>
    %326 = math.rsqrt %325 : vector<16x1xf32>
    %327 = vector.broadcast %326 : vector<16x1xf32> to vector<16x32xf32>
    %328 = arith.mulf %323, %327 : vector<16x32xf32>
    %329 = vector.shape_cast %308 : vector<32xf32> to vector<1x32xf32>
    %330 = vector.broadcast %329 : vector<1x32xf32> to vector<16x32xf32>
    %331 = arith.mulf %328, %330 : vector<16x32xf32>
    %332 = vector.shape_cast %310 : vector<32xf32> to vector<1x32xf32>
    %333 = vector.broadcast %332 : vector<1x32xf32> to vector<16x32xf32>
    %334 = arith.addf %331, %333 : vector<16x32xf32>
    %335 = vector.extract_strided_slice %7 {offsets = [1, 0, 0], sizes = [1, 32, 64], strides = [1, 1, 1]} : vector<2x32x64xf32> to vector<1x32x64xf32>
    %336 = vector.shape_cast %335 : vector<1x32x64xf32> to vector<32x64xf32>
    %cst_95 = arith.constant dense<0.000000e+00> : vector<16x64xf32>
    %337 = tpu.matmul %334, %336, %cst_95 {dimension_numbers = #tpu.dot_dimension_numbers<[1], [0], [0], [1], [0, 0, 1, 1], [], []>} : vector<16x32xf32>, vector<32x64xf32>, vector<16x64xf32> -> vector<16x64xf32>
    %338 = vector.extract_strided_slice %8 {offsets = [1, 0], sizes = [1, 64], strides = [1, 1]} : vector<2x64xf32> to vector<1x64xf32>
    %339 = vector.shape_cast %338 : vector<1x64xf32> to vector<64xf32>
    %340 = vector.shape_cast %339 : vector<64xf32> to vector<1x64xf32>
    %341 = vector.broadcast %340 : vector<1x64xf32> to vector<16x64xf32>
    %342 = arith.addf %337, %341 : vector<16x64xf32>
    %cst_96 = arith.constant 5.000000e-01 : f32
    %343 = vector.broadcast %cst_96 : f32 to vector<16x64xf32>
    %344 = arith.mulf %343, %342 : vector<16x64xf32>
    %cst_97 = arith.constant 2.000000e+00 : f32
    %345 = math.sqrt %cst_97 : f32
    %346 = vector.broadcast %345 : f32 to vector<16x64xf32>
    %347 = arith.divf %342, %346 : vector<16x64xf32>
    %348 = math.erf %347 : vector<16x64xf32>
    %cst_98 = arith.constant 1.000000e+00 : f32
    %349 = vector.broadcast %cst_98 : f32 to vector<16x64xf32>
    %350 = arith.addf %349, %348 : vector<16x64xf32>
    %351 = arith.mulf %344, %350 : vector<16x64xf32>
    %352 = vector.extract_strided_slice %9 {offsets = [1, 0, 0], sizes = [1, 64, 32], strides = [1, 1, 1]} : vector<2x64x32xf32> to vector<1x64x32xf32>
    %353 = vector.shape_cast %352 : vector<1x64x32xf32> to vector<64x32xf32>
    %cst_99 = arith.constant dense<0.000000e+00> : vector<16x32xf32>
    %354 = tpu.matmul %351, %353, %cst_99 {dimension_numbers = #tpu.dot_dimension_numbers<[1], [0], [0], [1], [0, 0, 1, 1], [], []>} : vector<16x64xf32>, vector<64x32xf32>, vector<16x32xf32> -> vector<16x32xf32>
    %355 = vector.extract_strided_slice %10 {offsets = [1, 0], sizes = [1, 32], strides = [1, 1]} : vector<2x32xf32> to vector<1x32xf32>
    %356 = vector.shape_cast %355 : vector<1x32xf32> to vector<32xf32>
    %357 = vector.shape_cast %356 : vector<32xf32> to vector<1x32xf32>
    %358 = vector.broadcast %357 : vector<1x32xf32> to vector<16x32xf32>
    %359 = arith.addf %354, %358 : vector<16x32xf32>
    %360 = arith.addf %359, %306 : vector<16x32xf32>
    %c0_100 = arith.constant 0 : index
    %c0_101 = arith.constant 0 : index
    %361 = vector.load %arg11[%c0_100, %c0_101] : memref<1x32xf32, #tpu.memory_space<vmem>>, vector<1x32xf32>
    %362 = vector.shape_cast %361 : vector<1x32xf32> to vector<32xf32>
    %c0_102 = arith.constant 0 : index
    %c0_103 = arith.constant 0 : index
    %363 = vector.load %arg12[%c0_102, %c0_103] : memref<1x32xf32, #tpu.memory_space<vmem>>, vector<1x32xf32>
    %364 = vector.shape_cast %363 : vector<1x32xf32> to vector<32xf32>
    %cst_104 = arith.constant dense<0.000000e+00> : vector<16xf32>
    %365 = vector.multi_reduction <add>, %360, %cst_104 [1] : vector<16x32xf32> to vector<16xf32>
    %366 = vector.shape_cast %365 : vector<16xf32> to vector<16x1xf32>
    %cst_105 = arith.constant 3.200000e+01 : f32
    %367 = vector.broadcast %cst_105 : f32 to vector<16x1xf32>
    %368 = arith.divf %366, %367 : vector<16x1xf32>
    %369 = vector.broadcast %368 : vector<16x1xf32> to vector<16x32xf32>
    %370 = arith.subf %360, %369 : vector<16x32xf32>
    %371 = arith.mulf %370, %370 : vector<16x32xf32>
    %cst_106 = arith.constant dense<0.000000e+00> : vector<16xf32>
    %372 = vector.multi_reduction <add>, %371, %cst_106 [1] : vector<16x32xf32> to vector<16xf32>
    %373 = vector.shape_cast %372 : vector<16xf32> to vector<16x1xf32>
    %cst_107 = arith.constant 3.200000e+01 : f32
    %374 = vector.broadcast %cst_107 : f32 to vector<16x1xf32>
    %375 = arith.divf %373, %374 : vector<16x1xf32>
    %376 = vector.broadcast %368 : vector<16x1xf32> to vector<16x32xf32>
    %377 = arith.subf %360, %376 : vector<16x32xf32>
    %cst_108 = arith.constant 9.99999997E-7 : f32
    %378 = vector.broadcast %cst_108 : f32 to vector<16x1xf32>
    %379 = arith.addf %375, %378 : vector<16x1xf32>
    %380 = math.rsqrt %379 : vector<16x1xf32>
    %381 = vector.broadcast %380 : vector<16x1xf32> to vector<16x32xf32>
    %382 = arith.mulf %377, %381 : vector<16x32xf32>
    %383 = vector.shape_cast %362 : vector<32xf32> to vector<1x32xf32>
    %384 = vector.broadcast %383 : vector<1x32xf32> to vector<16x32xf32>
    %385 = arith.mulf %382, %384 : vector<16x32xf32>
    %386 = vector.shape_cast %364 : vector<32xf32> to vector<1x32xf32>
    %387 = vector.broadcast %386 : vector<1x32xf32> to vector<16x32xf32>
    %388 = arith.addf %385, %387 : vector<16x32xf32>
    %c0_109 = arith.constant 0 : index
    %c0_110 = arith.constant 0 : index
    %389 = vector.load %arg13[%c0_109, %c0_110] : memref<16x32xf32, #tpu.memory_space<vmem>>, vector<16x32xf32>
    tpu.vector_store %arg13[%c0_109, %c0_110], %388 {strides = array<i32>} : memref<16x32xf32, #tpu.memory_space<vmem>>, vector<16x32xf32>,
    return
  }
}

</mosaic_0001>

<bundles_post_ra>
// kernel: tpu_custom_call.1
= control target key start
LH: loop header
LB: loop body
LE: loop exit
PB: predicated region body
PF: predicated region fallthrough
CT: control target
= control target key end

     0   :  { %18 = vsyncpa [#allocation3], 0  ;;  %s3342_s0 = inlined_call_operand.hbm [shape: f32[16,32], index: 0, kind: input, shape index: {}]   ;;  %s3343_s1 = inlined_call_operand.hbm [shape: f32[2,2,32], index: 1, kind: input, shape index: {}]   ;;  %s3344_s2 = inlined_call_operand.hbm [shape: f32[2,2,32], index: 2, kind: input, shape index: {}]   ;;  %s3345_s3 = inlined_call_operand.vmem [shape: f32[2,32,96], index: 3, kind: input, shape index: {}]   ;;  %s3346_s4 = inlined_call_operand.vmem [shape: f32[2,96], index: 4, kind: input, shape index: {}]   ;;  %s3347_s5 = inlined_call_operand.vmem [shape: f32[2,32,32], index: 5, kind: input, shape index: {}]   ;;  %s3348_s6 = inlined_call_operand.vmem [shape: f32[2,32], index: 6, kind: input, shape index: {}]   ;;  %s3349_s7 = inlined_call_operand.vmem [shape: f32[2,32,64], index: 7, kind: input, shape index: {}]   ;;  %s3350_s8 = inlined_call_operand.hbm [shape: f32[2,64], index: 8, kind: input, shape index: {}]   ;;  %s3351_s9 = inlined_call_operand.vmem [shape: f32[2,64,32], index: 9, kind: input, shape index: {}]   ;;  %s3352_s10 = inlined_call_operand.vmem [shape: f32[2,32], index: 10, kind: input, shape index: {}]   ;;  %s3353_s11 = inlined_call_operand.vmem [shape: f32[1,32], index: 11, kind: input, shape index: {}]   ;;  %s3354_s12 = inlined_call_operand.vmem [shape: f32[1,32], index: 12, kind: input, shape index: {}]   ;;  %s3355_s13 = inlined_call_operand.hbm [shape: f32[16,32], index: 13, kind: output, shape index: {}]  }
   0x1   :  { %19 = vsyncpa [#allocation6], 0 }
   0x2   :  { %20 = vsyncpa [#allocation9], 0  ;;  %s39_s27 = sshll.u32 %s3343_s1, 4  ;;  %s40_s27 = int_to_ptr.hbm [resolvable:$true] %s39_s27 }
   0x3   :  { %21 = vsyncpa [#allocation4], 0  ;;  %s2545_s28 = smov [#allocation5]   ;;  %s26_s15 = sshll.u32 %s3342_s0, 4  ;;  %s27_s15 = int_to_ptr.hbm [resolvable:$true] %s26_s15 }
   0x4   :  { %s41_s29 = sshll.u32 %s2545_s28, 4  ;;  %s2546_s16 = smov 32   ;;  %s42_s29 = int_to_ptr.vmem [resolvable:$true] %s41_s29 }
   0x5   :  { %s2547_s17 = smov 2   ;;  %s2548_s18 = smov [#allocation2]  }
   0x6   :  { %47 = dma.hbm_to_vmem [thread:$0]  %s40_s27, 64, %s42_s29, [#allocation6], %s2546_s16, %s2546_s16, %s2547_s17  }
   0x7   :  { %s28_s19 = sshll.u32 %s2548_s18, 4  ;;  %s3356_s20 = smov 128   ;;  %s29_s19 = int_to_ptr.vmem [resolvable:$true] %s28_s19 }
   0x8   :  { %s2550_s21 = smov 8   ;;  %s52_s23 = sshll.u32 %s3344_s2, 4  ;;  %s53_s23 = int_to_ptr.hbm [resolvable:$true] %s52_s23 }
   0x9   :  { %34 = dma.hbm_to_vmem [thread:$0]  %s27_s15, 256, %s29_s19, [#allocation3], %s3356_s20, %s3356_s20, %s2550_s21  }
   0xa   :  { %s2551_s24 = smov [#allocation7]   ;;  %s76_s27 = sshll.u32 %s3350_s8, 4  ;;  %s77_s27 = int_to_ptr.hbm [resolvable:$true] %s76_s27 }
   0xb   :  { %s54_s0 = sshll.u32 %s2551_s24, 4  ;;  %s2552_s28 = smov [#allocation8]   ;;  %s55_s0 = int_to_ptr.vmem [resolvable:$true] %s54_s0 }
   0xc   :  { %60 = dma.hbm_to_vmem [thread:$0]  %s53_s23, 64, %s55_s0, [#allocation6], %s2546_s16, %s2546_s16, %s2547_s17  }
   0xd   :  { %s78_s29 = sshll.u32 %s2552_s28, 4  ;;  %s79_s29 = int_to_ptr.vmem [resolvable:$true] %s78_s29 }
   0xe   :  { %81 = dma.hbm_to_vmem [thread:$0]  %s77_s27, 32, %s79_s29, [#allocation9]  }
   0xf   :  { %2537 = dma.done.wait [#allocation3], 256  }
  0x10   :  { %2538 = vsyncadd [#allocation3], 4294967040 }
  0x11   :  { %2539 = dma.done.wait [#allocation6], 128  }
  0x12   :  { %2540 = vsyncadd [#allocation6], 4294967168 }
  0x13   :  { %2541 = dma.done.wait [#allocation9], 32  }
  0x14   :  { %2542 = vsyncadd [#allocation9], 4294967264  ;;  %vm156_vm0 = vcmask 261120   ;;  %v2654_v0 = vld [vmem:[#allocation2] sm:$0xff]  ;;  %v2658_v2 = vld [vmem:[#allocation2 + $0x8] sm:$0xff]  ;;  %v2553_v4 = vmov 32.0  }
  0x15   :  { %v157_v1 = vsel %vm156_vm0, %v2654_v0, 0.0  ;;  %v160_v3 = vsel %vm156_vm0, %v2658_v2, 0.0  ;;  %2317 = vrcp.f32 %v2553_v4  ;;  %v115_v21 = vld [vmem:[%s3345_s3 + $0x18] sm:$0xff]  ;;  %v114_v22 = vld [vmem:[%s3345_s3 + $0x10] sm:$0xff]  ;;  %v113_v23 = vld [vmem:[%s3345_s3 + $0x8] sm:$0xff]  ;;  %s2554_s22 = smov 96  }
  0x16   :  { %158 = vadd.xlane.f32.xlu0 %v157_v1  ;;  %233 = vmatpush.msra.mxu0 %v115_v21  ;;  %v112_v24 = vld [vmem:[%s3345_s3] sm:$0xff]  ;;  %v2684_v36 = vld [vmem:[#allocation5] sm:$0x3]  ;;  %v2686_v40 = vld [vmem:[#allocation7] sm:$0x3]  ;;  %s2555_s23 = smov 120  }
  0x17   :  { %v208_v41 = vperm.slane %v2684_v36, 0  ;;  %v211_v45 = vperm.slane %v2686_v40, 0  ;;  %v120_v55 = vld [vmem:[%s3346_s4] sm:$0x3]  ;;  %s2556_s24 = smov 88   ;;  %s2557_s0 = smov 104  }
  0x18   :  { %234 = vmatpush.msra.mxu0 %v114_v22  ;;  %v214_v56 = vperm.slane %v120_v55, 0  ;;  %s2558_s25 = smov 112   ;;  %s2559_s26 = smov 72   ;;  %vm247_vm8 = vcmask 64512  }
  0x19   :  { %s2560_s27 = smov 80   ;;  %s2561_s28 = smov 64  }
  0x1a   :  { %235 = vmatpush.msra.mxu0 %v113_v23  ;;  %s2562_s29 = smov 56   ;;  %s2563_s2 = smov 48  }
  0x1b   :  { %v2318_v5 = vpop.eup %2317  ;;  %s2564_s8 = smov 40   ;;  %s3357_s30 = smov 16  }
  0x1c   :  { %v164_v6 = vmul.f32 32.0, %v2318_v5  ;;  %vm168_vm1 = vweird.f32 %v2318_v5  ;;  %236 = vmatpush.msra.mxu0 %v112_v24  ;;  %s2566_s14 = smov 24   ;;  %s2183_s1 = sshll.u32 %s3355_s13, 4  ;;  %s2184_s1 = int_to_ptr.hbm [resolvable:$true] %s2183_s1 }
  0x1e   :  { %161 = vadd.xlane.f32.xlu0 %v160_v3  ;;  %v165_v7 = vsub.f32 1.0, %v164_v6 }
  0x20   :  { %v166_v8 = vmul.f32 %v2318_v5, %v165_v7 }
  0x22   :  { %v167_v9 = vadd.f32 %v2318_v5, %v166_v8 }
  0x24   :  { %v2662_v10 = vsel %vm168_vm1, %v2318_v5, %v167_v9 }
  0x89   :  { %v159_v11 = vpop.xlane.xlu0 %158 }
  0x8a   :  { %v170_v12 = vmul.f32 %v2662_v10, %v159_v11 }
  0x8c   :  { %v172_v13 = vsub.f32 %v2654_v0, %v170_v12 }
  0x8e   :  { %v174_v14 = vmul.f32 %v172_v13, %v172_v13 }
  0x90   :  { %v176_v15 = vsel %vm156_vm0, %v174_v14, 0.0 }
  0x91   :  { %177 = vadd.xlane.f32.xlu1 %v176_v15  ;;  %v162_v16 = vpop.xlane.xlu0 %161 }
  0x92   :  { %v171_v17 = vmul.f32 %v2662_v10, %v162_v16 }
  0x94   :  { %v173_v18 = vsub.f32 %v2658_v2, %v171_v17 }
  0x96   :  { %v175_v19 = vmul.f32 %v173_v18, %v173_v18 }
  0x98   :  { %v179_v20 = vsel %vm156_vm0, %v175_v19, 0.0 }
  0x99   :  { %180 = vadd.xlane.f32.xlu1 %v179_v20 }
 0x104   :  { %v178_v25 = vpop.xlane.xlu1 %177 }
 0x105   :  { %v182_v26 = vmul.f32 %v178_v25, %v2662_v10 }
 0x107   :  { %v184_v27 = vadd.f32 1e-06, %v182_v26 }
 0x109   :  { %2319 = vrsqrt.f32 %v184_v27  ;;  %vm192_vm3 = vweird.f32 %v184_v27 }
 0x10c   :  { %v181_v28 = vpop.xlane.xlu1 %180 }
 0x10d   :  { %v183_v29 = vmul.f32 %v181_v28, %v2662_v10 }
 0x10f   :  { %v2320_v30 = vpop.eup %2319  ;;  %v185_v31 = vadd.f32 1e-06, %v183_v29 }
 0x110   :  { %v187_v32 = vmul.f32 %v2320_v30, %v184_v27  ;;  %vm193_vm2 = vweird.f32 %v2320_v30 }
 0x111   :  { %2321 = vrsqrt.f32 %v185_v31  ;;  %vm194_vm4 = vmor %vm192_vm3, %vm193_vm2  ;;  %vm202_vm6 = vweird.f32 %v185_v31 }
 0x112   :  { %v188_v33 = vmul.f32 %v2320_v30, %v187_v32 }
 0x114   :  { %v189_v34 = vmul.f32 0.5, %v188_v33 }
 0x116   :  { %v190_v35 = vsub.f32 1.5, %v189_v34 }
 0x117   :  { %v2322_v37 = vpop.eup %2321 }
 0x118   :  { %v191_v38 = vmul.f32 %v2320_v30, %v190_v35  ;;  %v197_v39 = vmul.f32 %v2322_v37, %v185_v31  ;;  %vm203_vm5 = vweird.f32 %v2322_v37 }
 0x119   :  { %vm204_vm7 = vmor %vm202_vm6, %vm203_vm5 }
 0x11a   :  { %v195_v42 = vsel %vm194_vm4, %v2320_v30, %v191_v38  ;;  %v198_v43 = vmul.f32 %v2322_v37, %v197_v39 }
 0x11b   :  { %v206_v44 = vmul.f32 %v195_v42, %v172_v13 }
 0x11c   :  { %v199_v46 = vmul.f32 0.5, %v198_v43 }
 0x11d   :  { %v209_v47 = vmul.f32 %v208_v41, %v206_v44 }
 0x11e   :  { %v200_v48 = vsub.f32 1.5, %v199_v46 }
 0x11f   :  { %v212_v49 = vadd.f32 %v211_v45, %v209_v47 }
 0x120   :  { %v201_v50 = vmul.f32 %v2322_v37, %v200_v48 }
 0x121   :  { %2198 = vmatmul.msk.f32.vlgmr.msra.gmra.mxu0 %vm156_vm0, %v212_v49 }
 0x122   :  { %v205_v51 = vsel %vm204_vm7, %v2322_v37, %v201_v50 }
 0x123   :  { %v207_v52 = vmul.f32 %v205_v51, %v173_v18 }
 0x125   :  { %v210_v53 = vmul.f32 %v208_v41, %v207_v52 }
 0x127   :  { %v213_v54 = vadd.f32 %v211_v45, %v210_v53 }
 0x129   :  { %2199 = vmatmul.msk.f32.gmra.mxu0 %vm156_vm0, %v213_v54 }
 0x19e   :  { %v238_v57 = vpop.f32.mrf.mxu0 }
 0x19f   :  { %v2695_v58 = vadd.f32 %v238_v57, %v214_v56 }
 0x1a1   :  { %245 = vrot.lane.b32.xlu2 %v2695_v58, %s2554_s22 }
 0x1a6   :  { %v241_v59 = vpop.f32.mrf.mxu0 }
 0x1a7   :  { %v2699_v60 = vadd.f32 %v241_v59, %v214_v56 }
 0x1a9   :  { %429 = vrot.lane.b32.xlu1 %v2699_v60, %s2555_s23  ;;  %431 = vrot.lane.b32.xlu0 %v2699_v60, %s2556_s24  ;;  %v2290_v39 = vpack.i.bf16 %v2699_v60, %v2695_v58 }
 0x1aa   :  { %273 = vrot.lane.b32.xlu2 %v2699_v60, %s2554_s22 }
 0x1b1   :  { %717 = vrot.lane.b32.xlu1 %v2695_v58, %s2557_s0  ;;  %559 = vrot.lane.b32.xlu0 %v2695_v58, %s2558_s25 }
 0x1b2   :  { %403 = vrot.lane.b32.xlu2 %v2695_v58, %s2556_s24 }
 0x1b9   :  { %747 = vrot.lane.b32.xlu1 %v2699_v60, %s2559_s26  ;;  %589 = vrot.lane.b32.xlu0 %v2699_v60, %s2560_s27 }
 0x1ba   :  { %561 = vrot.lane.b32.xlu2 %v2695_v58, %s2560_s27 }
 0x1c1   :  { %745 = vrot.lane.b32.xlu0 %v2699_v60, %s2557_s0 }
 0x1c2   :  { %401 = vrot.lane.b32.xlu2 %v2695_v58, %s2555_s23 }
 0x1ca   :  { %719 = vrot.lane.b32.xlu2 %v2695_v58, %s2559_s26 }
 0x1d2   :  { %587 = vrot.lane.b32.xlu2 %v2699_v60, %s2558_s25 }
 0x1fb   :  { %v246_v61 = vpop.permute.xlu2 %245 }
 0x1fc   :  { %2200 = vmatpush.xpose.msk.msra.mxu2 %vm247_vm8, %v246_v61 }
 0x1ff   :  { %2201 = vmatmul.msk.f32.vlgmr.msra.gmra.mxu2 %vm247_vm8, %v2695_v58 }
 0x204   :  { %v274_v62 = vpop.permute.xlu2 %273 }
 0x205   :  { %2202 = vmatpush.xpose.msk.msrb.mxu2 %vm247_vm8, %v274_v62 }
 0x208   :  { %2203 = vmatmul.msk.f32.vlgmr.msrb.gmra.mxu2 %vm247_vm8, %v2699_v60 }
 0x20c   :  { %v404_v63 = vpop.permute.xlu2 %403 }
 0x20d   :  { %2206 = vmatpush.xpose.msk.msra.mxu1 %vm247_vm8, %v404_v63 }
 0x214   :  { %v562_v1 = vpop.permute.xlu2 %561 }
 0x21b   :  { %v430_v3 = vpop.permute.xlu1 %429  ;;  %v432_v4 = vpop.permute.xlu0 %431 }
 0x21c   :  { %v402_v5 = vpop.permute.xlu2 %401  ;;  %2208 = vmatpush.xpose.msk.msra.mxu2 %vm247_vm8, %v432_v4 }
 0x21d   :  { %2207 = vmatmul.msk.f32.vlgmr.msra.gmra.mxu1 %vm247_vm8, %v402_v5 }
 0x21f   :  { %2209 = vmatmul.msk.f32.vlgmr.msra.gmra.mxu2 %vm247_vm8, %v430_v3 }
 0x220   :  { %2212 = vmatpush.xpose.msk.msrb.mxu2 %vm247_vm8, %v562_v1 }
 0x223   :  { %v718_v6 = vpop.permute.xlu1 %717  ;;  %v560_v7 = vpop.permute.xlu0 %559 }
 0x224   :  { %v720_v8 = vpop.permute.xlu2 %719 }
 0x225   :  { %2218 = vmatpush.xpose.msk.msra.mxu2 %vm247_vm8, %v720_v8 }
 0x227   :  { %2213 = vmatmul.msk.f32.vlgmr.msrb.gmra.mxu2 %vm247_vm8, %v560_v7 }
 0x22b   :  { %v748_v9 = vpop.permute.xlu1 %747  ;;  %v590_v11 = vpop.permute.xlu0 %589 }
 0x22c   :  { %2214 = vmatpush.xpose.msk.msrb.mxu0 %vm247_vm8, %v590_v11  ;;  %v588_v12 = vpop.permute.xlu2 %587 }
 0x22f   :  { %2215 = vmatmul.msk.f32.vlgmr.msrb.gmra.mxu0 %vm247_vm8, %v588_v12  ;;  %2219 = vmatmul.msk.f32.vlgmr.msra.gmra.mxu2 %vm247_vm8, %v718_v6 }
 0x230   :  { %2220 = vmatpush.xpose.msk.msra.mxu0 %vm247_vm8, %v748_v9 }
 0x233   :  { %v746_v13 = vpop.permute.xlu0 %745 }
 0x237   :  { %2221 = vmatmul.msk.f32.vlgmr.msra.gmra.mxu0 %vm247_vm8, %v746_v13 }
 0x282   :  { %v269_v14 = vpop.f32.mrf.mxu2 }
 0x283   :  { %v299_v15 = vmul.f32 0.35355338, %v269_v14 }
 0x285   :  { %v301_v16 = vsel %vm247_vm8, %v299_v15, -inf }
 0x286   :  { %302 = vmax.xlane.f32.xlu2 %v301_v16 }
 0x28b   :  { %v296_v17 = vpop.f32.mrf.mxu2 }
 0x28c   :  { %v300_v18 = vmul.f32 0.35355338, %v296_v17 }
 0x28e   :  { %v304_v19 = vsel %vm247_vm8, %v300_v18, -inf }
 0x28f   :  { %305 = vmax.xlane.f32.xlu1 %v304_v19 }
 0x29a   :  { %v426_v20 = vpop.f32.mrf.mxu1 }
 0x29b   :  { %v457_v21 = vmul.f32 0.35355338, %v426_v20 }
 0x29d   :  { %v459_v22 = vsel %vm247_vm8, %v457_v21, -inf }
 0x29e   :  { %460 = vmax.xlane.f32.xlu0 %v459_v22 }
 0x2a2   :  { %v454_v23 = vpop.f32.mrf.mxu2 }
 0x2a3   :  { %v458_v37 = vmul.f32 0.35355338, %v454_v23 }
 0x2a5   :  { %v462_v38 = vsel %vm247_vm8, %v458_v37, -inf }
 0x2aa   :  { %v584_v24 = vpop.f32.mrf.mxu2 }
 0x2ab   :  { %v615_v29 = vmul.f32 0.35355338, %v584_v24 }
 0x2ac   :  { %v612_v25 = vpop.f32.mrf.mxu0 }
 0x2ad   :  { %v616_v26 = vmul.f32 0.35355338, %v612_v25  ;;  %v617_v35 = vsel %vm247_vm8, %v615_v29, -inf }
 0x2af   :  { %v620_v27 = vsel %vm247_vm8, %v616_v26, -inf }
 0x2b0   :  { %621 = vmax.xlane.f32.xlu2 %v620_v27 }
 0x2b2   :  { %v742_v28 = vpop.f32.mrf.mxu2 }
 0x2b3   :  { %v2749_v30 = vmul.f32 0.35355338, %v742_v28 }
 0x2b4   :  { %v770_v31 = vpop.f32.mrf.mxu0 }
 0x2b5   :  { %v774_v32 = vmul.f32 0.35355338, %v770_v31  ;;  %v775_v33 = vsel %vm247_vm8, %v2749_v30, -inf }
 0x2b6   :  { %776 = vmax.xlane.f32.xlu0 %v775_v33 }
 0x2b7   :  { %v778_v34 = vsel %vm247_vm8, %v774_v32, -inf }
 0x2b8   :  { %779 = vmax.xlane.f32.xlu1 %v778_v34  ;;  %618 = vmax.xlane.f32.xlu2 %v617_v35 }
 0x2c0   :  { %463 = vmax.xlane.f32.xlu1 %v462_v38 }
 0x2ca   :  { %2291 = vrot.lane.b32.xlu0 %v2290_v39, %s2561_s28 }
 0x2d9   :  { %507 = vrot.lane.b32.xlu1 %v2695_v58, %s2562_s29 }
 0x2f9   :  { %v303_v41 = vpop.xlane.xlu2 %302 }
 0x2fa   :  { %v307_v42 = vsub.f32 %v299_v15, %v303_v41 }
 0x2fc   :  { %v309_v43 = vmul.f32 1.442695, %v307_v42 }
 0x2fe   :  { %2323 = vpow2.f32 %v309_v43 }
 0x302   :  { %v306_v51 = vpop.xlane.xlu1 %305 }
 0x303   :  { %v308_v54 = vsub.f32 %v300_v18, %v306_v51 }
 0x304   :  { %v2761_v44 = vpop.eup %2323 }
 0x305   :  { %v313_v45 = vsel %vm247_vm8, %v2761_v44, 0.0  ;;  %v311_v56 = vmul.f32 1.442695, %v308_v54 }
 0x306   :  { %314 = vadd.xlane.f32.xlu0 %v313_v45 }
 0x311   :  { %v461_v46 = vpop.xlane.xlu0 %460 }
 0x312   :  { %v465_v47 = vsub.f32 %v457_v21, %v461_v46 }
 0x314   :  { %v467_v48 = vmul.f32 1.442695, %v465_v47 }
 0x316   :  { %2325 = vpow2.f32 %v467_v48 }
 0x31a   :  { %665 = vrot.lane.b32.xlu0 %v2695_v58, %s2563_s2 }
 0x31c   :  { %v2767_v49 = vpop.eup %2325 }
 0x31d   :  { %v471_v50 = vsel %vm247_vm8, %v2767_v49, 0.0 }
 0x31e   :  { %472 = vadd.xlane.f32.xlu1 %v471_v50 }
 0x322   :  { %533 = vrot.lane.b32.xlu0 %v2699_v60, %s2562_s29 }
 0x323   :  { %v622_v52 = vpop.xlane.xlu2 %621 }
 0x324   :  { %v624_v53 = vsub.f32 %v616_v26, %v622_v52 }
 0x326   :  { %v627_v55 = vmul.f32 1.442695, %v624_v53 }
 0x328   :  { %2327 = vpow2.f32 %v627_v55 }
 0x329   :  { %2329 = vpow2.f32 %v311_v56  ;;  %v777_v4 = vpop.xlane.xlu0 %776 }
 0x32a   :  { %691 = vrot.lane.b32.xlu0 %v2699_v60, %s2563_s2  ;;  %v781_v17 = vsub.f32 %v2749_v30, %v777_v4 }
 0x32b   :  { %v780_v57 = vpop.xlane.xlu1 %779  ;;  %v619_v5 = vpop.xlane.xlu2 %618 }
 0x32c   :  { %v782_v61 = vsub.f32 %v774_v32, %v780_v57  ;;  %v623_v8 = vsub.f32 %v615_v29, %v619_v5  ;;  %v783_v20 = vmul.f32 1.442695, %v781_v17 }
 0x32e   :  { %v2775_v59 = vpop.eup %2327  ;;  %v785_v63 = vmul.f32 1.442695, %v782_v61  ;;  %v625_v11 = vmul.f32 1.442695, %v623_v8 }
 0x32f   :  { %v632_v62 = vsel %vm247_vm8, %v2775_v59, 0.0  ;;  %v2779_v3 = vpop.eup %2329 }
 0x330   :  { %633 = vadd.xlane.f32.xlu2 %v632_v62  ;;  %2331 = vpow2.f32 %v785_v63  ;;  %v316_v9 = vsel %vm247_vm8, %v2779_v3, 0.0 }
 0x333   :  { %v464_v1 = vpop.xlane.xlu1 %463 }
 0x334   :  { %v466_v6 = vsub.f32 %v458_v37, %v464_v1 }
 0x336   :  { %v469_v7 = vmul.f32 1.442695, %v466_v6  ;;  %v2783_v13 = vpop.eup %2331 }
 0x337   :  { %v790_v19 = vsel %vm247_vm8, %v2783_v13, 0.0 }
 0x338   :  { %2333 = vpow2.f32 %v469_v7  ;;  %317 = vadd.xlane.f32.xlu2 %v316_v9 }
 0x339   :  { %2335 = vpow2.f32 %v625_v11 }
 0x33a   :  { %2337 = vpow2.f32 %v783_v20 }
 0x33c   :  { %v2292_v12 = vpop.permute.xlu0 %2291 }
 0x33d   :  { %v2293_v14 = vunpack.i.l.bf16 %v2292_v12  ;;  %v2294_v15 = vunpack.i.h.bf16 %v2292_v12 }
 0x33e   :  { %v2785_v16 = vpop.eup %2333 }
 0x33f   :  { %370 = vmatpush.msra.mxu3 %v2293_v14  ;;  %v474_v18 = vsel %vm247_vm8, %v2785_v16, 0.0  ;;  %v2792_v21 = vpop.eup %2335 }
 0x340   :  { %475 = vadd.xlane.f32.xlu1 %v474_v18  ;;  %791 = vadd.xlane.f32.xlu2 %v790_v19  ;;  %v629_v22 = vsel %vm247_vm8, %v2792_v21, 0.0  ;;  %v2796_v23 = vpop.eup %2337 }
 0x341   :  { %396 = vmatpush.msrb.mxu3 %v2294_v15  ;;  %v787_v24 = vsel %vm247_vm8, %v2796_v23, 0.0 }
 0x348   :  { %630 = vadd.xlane.f32.xlu2 %v629_v22 }
 0x350   :  { %788 = vadd.xlane.f32.xlu2 %v787_v24 }
 0x359   :  { %849 = vrot.lane.b32.xlu1 %v2699_v60, %s2564_s8 }
 0x368   :  { %823 = vrot.lane.b32.xlu2 %v2695_v58, %s2564_s8  ;;  %v508_v58 = vpop.permute.xlu1 %507 }
 0x379   :  { %v315_v25 = vpop.xlane.xlu0 %314 }
 0x37a   :  { %2339 = vrcp.f32 %v315_v25  ;;  %v330_v29 = vand.u32 2147483648, %v315_v25  ;;  %v328_v31 = vand.u32 2147483647, %v315_v25  ;;  %vm324_vm10 = vweird.f32 %v315_v25 }
 0x37c   :  { %v331_v33 = vor.u32 1.1754944e-38, %v330_v29  ;;  %vm329_vm12 = vcmp.eq.f32.partialorder %v328_v31, 8.507059e+37 }
 0x380   :  { %v2340_v26 = vpop.eup %2339 }
 0x381   :  { %v320_v27 = vmul.f32 %v2340_v26, %v315_v25  ;;  %vm325_vm9 = vweird.f32 %v2340_v26 }
 0x382   :  { %vm326_vm11 = vmor %vm324_vm10, %vm325_vm9 }
 0x383   :  { %v321_v28 = vsub.f32 1.0, %v320_v27 }
 0x385   :  { %v322_v30 = vmul.f32 %v2340_v26, %v321_v28 }
 0x387   :  { %v323_v32 = vadd.f32 %v2340_v26, %v322_v30 }
 0x389   :  { %v327_v34 = vsel %vm326_vm11, %v2340_v26, %v323_v32 }
 0x38a   :  { %v332_v35 = vsel %vm329_vm12, %v331_v33, %v327_v34 }
 0x38b   :  { %v347_v60 = vmul.f32 %v2761_v44, %v332_v35 }
 0x38c   :  { %v2805_v37 = vpop.permute.xlu0 %665 }
 0x38d   :  { %2204 = vmatmul.msk.f32.vlgmr.msra.gmra.mxu3 %vm247_vm8, %v347_v60 }
 0x38e   :  { %528 = vmatpush.msra.mxu3 %v508_v58 }
 0x391   :  { %v473_v41 = vpop.xlane.xlu1 %472 }
 0x392   :  { %2341 = vrcp.f32 %v473_v41  ;;  %vm482_vm3 = vweird.f32 %v473_v41  ;;  %v488_v8 = vand.u32 2147483648, %v473_v41  ;;  %v486_v15 = vand.u32 2147483647, %v473_v41 }
 0x394   :  { %v534_v38 = vpop.permute.xlu0 %533  ;;  %v489_v26 = vor.u32 1.1754944e-38, %v488_v8  ;;  %vm487_vm6 = vcmp.eq.f32.partialorder %v486_v15, 8.507059e+37 }
 0x395   :  { %554 = vmatpush.msrb.mxu1 %v534_v38 }
 0x398   :  { %v2342_v43 = vpop.eup %2341 }
 0x399   :  { %v478_v44 = vmul.f32 %v2342_v43, %v473_v41  ;;  %vm483_vm15 = vweird.f32 %v2342_v43 }
 0x39a   :  { %vm2820_vm4 = vmor %vm482_vm3, %vm483_vm15 }
 0x39b   :  { %v479_v47 = vsub.f32 1.0, %v478_v44 }
 0x39c   :  { %v692_v39 = vpop.permute.xlu0 %691 }
 0x39d   :  { %712 = vmatpush.msra.mxu1 %v692_v39  ;;  %v480_v54 = vmul.f32 %v2342_v43, %v479_v47 }
 0x39f   :  { %v481_v1 = vadd.f32 %v2342_v43, %v480_v54 }
 0x3a1   :  { %v485_v18 = vsel %vm2820_vm4, %v2342_v43, %v481_v1 }
 0x3a2   :  { %v490_v29 = vsel %vm487_vm6, %v489_v26, %v485_v18  ;;  %v124_v26 = vld [vmem:[%s3347_s5 + $0x18] sm:$0xff] }
 0x3a3   :  { %v2808_v42 = vpop.xlane.xlu2 %633  ;;  %v505_v41 = vmul.f32 %v2767_v49, %v490_v29  ;;  %926 = vmatpush.msrb.mxu2 %v124_v26  ;;  %v121_v29 = vld [vmem:[%s3347_s5] sm:$0xff] }
 0x3a4   :  { %vm654_vm12 = vweird.f32 %v2808_v42  ;;  %v660_v58 = vand.u32 2147483648, %v2808_v42  ;;  %v658_v38 = vand.u32 2147483647, %v2808_v42 }
 0x3a6   :  { %vm659_vm15 = vcmp.eq.f32.partialorder %v658_v38, 8.507059e+37 }
 0x3ab   :  { %v318_v45 = vpop.xlane.xlu2 %317 }
 0x3ac   :  { %2343 = vrcp.f32 %v318_v45  ;;  %v344_v56 = vand.u32 2147483648, %v318_v45  ;;  %v342_v61 = vand.u32 2147483647, %v318_v45  ;;  %vm338_vm14 = vweird.f32 %v318_v45 }
 0x3ad   :  { %2345 = vrcp.f32 %v2808_v42 }
 0x3ae   :  { %v345_v4 = vor.u32 1.1754944e-38, %v344_v56  ;;  %vm343_vm2 = vcmp.eq.f32.partialorder %v342_v61, 8.507059e+37 }
 0x3b2   :  { %v2344_v46 = vpop.eup %2343 }
 0x3b3   :  { %v2811_v48 = vpop.eup %2345  ;;  %v334_v50 = vmul.f32 %v2344_v46, %v318_v45  ;;  %v476_v51 = vpop.xlane.xlu1 %475  ;;  %vm339_vm13 = vweird.f32 %v2344_v46 }
 0x3b4   :  { %2347 = vrcp.f32 %v476_v51  ;;  %v2813_v52 = vpop.xlane.xlu2 %791  ;;  %v650_v55 = vmul.f32 %v2811_v48, %v2808_v42  ;;  %vm340_vm1 = vmor %vm338_vm14, %vm339_vm13  ;;  %v502_v19 = vand.u32 2147483648, %v476_v51  ;;  %v500_v25 = vand.u32 2147483647, %v476_v51 }
 0x3b5   :  { %v335_v53 = vsub.f32 1.0, %v334_v50  ;;  %2349 = vrcp.f32 %v2813_v52  ;;  %vm496_vm7 = vweird.f32 %v476_v51  ;;  %vm655_vm10 = vweird.f32 %v2811_v48 }
 0x3b6   :  { %v651_v5 = vsub.f32 1.0, %v650_v55  ;;  %v503_v30 = vor.u32 1.1754944e-38, %v502_v19  ;;  %vm501_vm11 = vcmp.eq.f32.partialorder %v500_v25, 8.507059e+37  ;;  %vm2836_vm13 = vmor %vm654_vm12, %vm655_vm10  ;;  %v661_v42 = vor.u32 1.1754944e-38, %v660_v58 }
 0x3b7   :  { %v336_v57 = vmul.f32 %v2344_v46, %v335_v53  ;;  %v818_v61 = vand.u32 2147483648, %v2813_v52 }
 0x3b8   :  { %v652_v22 = vmul.f32 %v2811_v48, %v651_v5 }
 0x3b9   :  { %v337_v62 = vadd.f32 %v2344_v46, %v336_v57 }
 0x3ba   :  { %v2348_v63 = vpop.eup %2347  ;;  %v653_v31 = vadd.f32 %v2811_v48, %v652_v22 }
 0x3bb   :  { %v492_v6 = vmul.f32 %v2348_v63, %v476_v51  ;;  %v341_v7 = vsel %vm340_vm1, %v2344_v46, %v337_v62  ;;  %v2818_v12 = vpop.eup %2349  ;;  %vm497_vm5 = vweird.f32 %v2348_v63 }
 0x3bc   :  { %v631_v9 = vpop.xlane.xlu2 %630  ;;  %v346_v11 = vsel %vm343_vm2, %v345_v4, %v341_v7  ;;  %v808_v27 = vmul.f32 %v2818_v12, %v2813_v52  ;;  %vm498_vm9 = vmor %vm496_vm7, %vm497_vm5  ;;  %v657_v45 = vsel %vm2836_vm13, %v2811_v48, %v653_v31  ;;  %vm813_vm2 = vweird.f32 %v2818_v12 }
 0x3bd   :  { %v493_v17 = vsub.f32 1.0, %v492_v6  ;;  %2351 = vrcp.f32 %v631_v9  ;;  %v348_v20 = vmul.f32 %v2779_v3, %v346_v11  ;;  %v646_v44 = vand.u32 2147483648, %v631_v9 }
 0x3be   :  { %v809_v33 = vsub.f32 1.0, %v808_v27  ;;  %v644_v50 = vand.u32 2147483647, %v631_v9  ;;  %vm640_vm1 = vweird.f32 %v631_v9  ;;  %vm812_vm5 = vweird.f32 %v2813_v52  ;;  %v123_v27 = vld [vmem:[%s3347_s5 + $0x10] sm:$0xff] }
 0x3bf   :  { %v494_v24 = vmul.f32 %v2348_v63, %v493_v17  ;;  %2205 = vmatmul.msk.f32.vlgmr.msrb.gmra.mxu3 %vm247_vm8, %v348_v20  ;;  %v647_v48 = vor.u32 1.1754944e-38, %v646_v44  ;;  %vm814_vm6 = vmor %vm812_vm5, %vm813_vm2  ;;  %v819_v11 = vor.u32 1.1754944e-38, %v818_v61  ;;  %927 = vmatpush.msrb.mxu2 %v123_v27  ;;  %vm901_vm13 = vcmask 130048  }
 0x3c0   :  { %686 = vmatpush.msrb.mxu3 %v2805_v37  ;;  %v810_v46 = vmul.f32 %v2818_v12, %v809_v33  ;;  %vm645_vm4 = vcmp.eq.f32.partialorder %v644_v50, 8.507059e+37 }
 0x3c1   :  { %v495_v28 = vadd.f32 %v2348_v63, %v494_v24 }
 0x3c2   :  { %v811_v54 = vadd.f32 %v2818_v12, %v810_v46 }
 0x3c3   :  { %v2352_v3 = vpop.eup %2351  ;;  %v499_v32 = vsel %vm498_vm9, %v2348_v63, %v495_v28  ;;  %v816_v63 = vand.u32 2147483647, %v2813_v52  ;;  %v122_v28 = vld [vmem:[%s3347_s5 + $0x8] sm:$0xff] }
 0x3c4   :  { %v636_v34 = vmul.f32 %v2352_v3, %v631_v9  ;;  %v789_v35 = vpop.xlane.xlu2 %788  ;;  %v504_v60 = vsel %vm501_vm11, %v503_v30, %v499_v32  ;;  %vm641_vm14 = vweird.f32 %v2352_v3  ;;  %v815_v7 = vsel %vm814_vm6, %v2818_v12, %v811_v54  ;;  %928 = vmatpush.msrb.mxu2 %v122_v28 }
 0x3c5   :  { %2353 = vrcp.f32 %v789_v35  ;;  %v506_v43 = vmul.f32 %v2785_v16, %v504_v60  ;;  %v662_v16 = vsel %vm659_vm15, %v661_v42, %v657_v45  ;;  %vm642_vm3 = vmor %vm640_vm1, %vm641_vm14  ;;  %v804_v6 = vand.u32 2147483648, %v789_v35 }
 0x3c6   :  { %v637_v39 = vsub.f32 1.0, %v636_v34  ;;  %v664_v5 = vmul.f32 %v2775_v59, %v662_v16  ;;  %v802_v9 = vand.u32 2147483647, %v789_v35  ;;  %vm817_vm9 = vcmp.eq.f32.partialorder %v816_v63, 8.507059e+37  ;;  %929 = vmatpush.msrb.mxu2 %v121_v29  ;;  %v132_v63 = vld [vmem:[%s3349_s7 + $0x10] sm:$0xff] }
 0x3c7   :  { %2210 = vmatmul.msk.f32.vlgmr.msra.gmra.mxu3 %vm247_vm8, %v505_v41  ;;  %2211 = vmatmul.msk.f32.vlgmr.msrb.gmra.mxu1 %vm247_vm8, %v506_v43  ;;  %vm798_vm10 = vweird.f32 %v789_v35  ;;  %v805_v59 = vor.u32 1.1754944e-38, %v804_v6  ;;  %vm904_vm14 = vcmask 195584   ;;  %v129_v41 = vld [vmem:[%s3348_s6] sm:$0x3] }
 0x3c8   :  { %v638_v47 = vmul.f32 %v2352_v3, %v637_v39  ;;  %vm803_vm12 = vcmp.eq.f32.partialorder %v802_v9, 8.507059e+37  ;;  %v907_v43 = vperm.slane %v129_v41, 0 }
 0x3ca   :  { %v639_v51 = vadd.f32 %v2352_v3, %v638_v47 }
 0x3cb   :  { %v2354_v49 = vpop.eup %2353  ;;  %v850_v53 = vpop.permute.xlu1 %849 }
 0x3cc   :  { %v643_v55 = vsel %vm642_vm3, %v2352_v3, %v639_v51  ;;  %v794_v56 = vmul.f32 %v2354_v49, %v789_v35  ;;  %v824_v57 = vpop.permute.xlu2 %823  ;;  %870 = vmatpush.msrb.mxu1 %v850_v53  ;;  %vm799_vm7 = vweird.f32 %v2354_v49 }
 0x3cd   :  { %v648_v62 = vsel %vm645_vm4, %v647_v48, %v643_v55  ;;  %844 = vmatpush.msra.mxu3 %v824_v57  ;;  %vm800_vm11 = vmor %vm798_vm10, %vm799_vm7 }
 0x3ce   :  { %v795_v1 = vsub.f32 1.0, %v794_v56  ;;  %v663_v4 = vmul.f32 %v2792_v21, %v648_v62  ;;  %v820_v21 = vsel %vm817_vm9, %v819_v11, %v815_v7  ;;  %v133_v62 = vld [vmem:[%s3349_s7 + $0x18] sm:$0xff] }
 0x3cf   :  { %2217 = vmatmul.msk.f32.vlgmr.msra.gmra.mxu1 %vm247_vm8, %v664_v5  ;;  %v822_v12 = vmul.f32 %v2783_v13, %v820_v21  ;;  %1008 = vmatpush.msrb.mxu0 %v133_v62 }
 0x3d0   :  { %v796_v8 = vmul.f32 %v2354_v49, %v795_v1  ;;  %2216 = vmatmul.msk.f32.vlgmr.msrb.gmra.mxu3 %vm247_vm8, %v663_v4  ;;  %v131_v1 = vld [vmem:[%s3349_s7 + $0x8] sm:$0xff]  ;;  %v130_v4 = vld [vmem:[%s3349_s7] sm:$0xff] }
 0x3d1   :  { %1009 = vmatpush.msrb.mxu0 %v132_v63 }
 0x3d2   :  { %v797_v52 = vadd.f32 %v2354_v49, %v796_v8 }
 0x3d3   :  { %1010 = vmatpush.msrb.mxu0 %v131_v1  ;;  %v142_v1 = vld [vmem:[%s3351_s9 + $0x18] sm:$0xff] }
 0x3d4   :  { %v801_v14 = vsel %vm800_vm11, %v2354_v49, %v797_v52 }
 0x3d5   :  { %v806_v15 = vsel %vm803_vm12, %v805_v59, %v801_v14  ;;  %1011 = vmatpush.msrb.mxu0 %v130_v4 }
 0x3d6   :  { %v821_v17 = vmul.f32 %v2796_v23, %v806_v15 }
 0x3d7   :  { %2223 = vmatmul.msk.f32.vlgmr.msrb.gmra.mxu1 %vm247_vm8, %v822_v12 }
 0x3d8   :  { %2222 = vmatmul.msk.f32.vlgmr.msra.gmra.mxu3 %vm247_vm8, %v821_v17 }
 0x410   :  { %v372_v18 = vpop.f32.mrf.mxu3 }
 0x442   :  { %v398_v19 = vpop.f32.mrf.mxu3 }
 0x444   :  { %v556_v20 = vpop.f32.mrf.mxu1 }
 0x44a   :  { %v530_v22 = vpop.f32.mrf.mxu3 }
 0x44b   :  { %877 = vrot.lane.b32.xlu0 %v530_v22, %s2550_s21 }
 0x44c   :  { %v714_v24 = vpop.f32.mrf.mxu1 }
 0x44d   :  { %887 = vrot.lane.b32.xlu2 %v714_v24, %s3357_s30  ;;  %v986_v24 = vperm.slane %v2686_v40, 1 }
 0x453   :  { %v688_v25 = vpop.f32.mrf.mxu3 }
 0x454   :  { %885 = vrot.lane.b32.xlu1 %v688_v25, %s3357_s30  ;;  %v872_v13 = vpop.f32.mrf.mxu1 }
 0x45b   :  { %v846_v23 = vpop.f32.mrf.mxu3 }
 0x45c   :  { %879 = vrot.lane.b32.xlu1 %v556_v20, %s2550_s21  ;;  %893 = vrot.lane.b32.xlu0 %v846_v23, %s2566_s14 }
 0x464   :  { %895 = vrot.lane.b32.xlu0 %v872_v13, %s2566_s14 }
 0x4a7   :  { %v888_v58 = vpop.permute.xlu2 %887 }
 0x4bd   :  { %v878_v30 = vpop.permute.xlu0 %877 }
 0x4be   :  { %v899_v31 = vsel %vm247_vm8, %v372_v18, %v878_v30 }
 0x4c6   :  { %v886_v3 = vpop.permute.xlu1 %885 }
 0x4c7   :  { %v902_v32 = vsel %vm901_vm13, %v899_v31, %v886_v3  ;;  %v2567_v31 = vmov 1.4142135  }
 0x4ce   :  { %v894_v33 = vpop.permute.xlu0 %893  ;;  %v880_v35 = vpop.permute.xlu1 %879 }
 0x4cf   :  { %v905_v34 = vsel %vm904_vm14, %v902_v32, %v894_v33  ;;  %v900_v60 = vsel %vm247_vm8, %v398_v19, %v880_v35  ;;  %v983_v19 = vperm.slane %v2684_v36, 1  ;;  %v138_v35 = vld [vmem:[#allocation8] sm:$0x3] }
 0x4d0   :  { %2224 = vmatmul.msk.f32.vlgmr.msrb.gmra.mxu2 %vm156_vm0, %v905_v34  ;;  %v903_v38 = vsel %vm901_vm13, %v900_v60, %v888_v58  ;;  %v989_v58 = vperm.slane %v138_v35, 0 }
 0x4d6   :  { %v896_v37 = vpop.permute.xlu0 %895 }
 0x4d7   :  { %v906_v39 = vsel %vm904_vm14, %v903_v38, %v896_v37 }
 0x4d8   :  { %2225 = vmatmul.msk.f32.gmra.mxu2 %vm156_vm0, %v906_v39 }
 0x553   :  { %v931_v45 = vpop.f32.mrf.mxu2 }
 0x554   :  { %v932_v44 = vadd.f32 %v931_v45, %v907_v43 }
 0x556   :  { %v2895_v46 = vadd.f32 %v932_v44, %v2654_v0 }
 0x558   :  { %v939_v47 = vsel %vm156_vm0, %v2895_v46, 0.0 }
 0x559   :  { %940 = vadd.xlane.f32.xlu1 %v939_v47  ;;  %v146_v47 = vld [vmem:[%s3351_s9 + $0x38] sm:$0xff] }
 0x55a   :  { %1130 = vmatpush.msrb.mxu3 %v146_v47 }
 0x55b   :  { %v934_v50 = vpop.f32.mrf.mxu2 }
 0x55c   :  { %v935_v42 = vadd.f32 %v934_v50, %v907_v43 }
 0x55e   :  { %v2900_v51 = vadd.f32 %v935_v42, %v2658_v2 }
 0x560   :  { %v942_v49 = vsel %vm156_vm0, %v2900_v51, 0.0 }
 0x561   :  { %943 = vadd.xlane.f32.xlu2 %v942_v49 }
 0x5cc   :  { %v941_v16 = vpop.xlane.xlu1 %940 }
 0x5cd   :  { %v945_v48 = vmul.f32 %v941_v16, %v2662_v10  ;;  %v145_v16 = vld [vmem:[%s3351_s9 + $0x30] sm:$0xff] }
 0x5ce   :  { %1131 = vmatpush.msrb.mxu3 %v145_v16 }
 0x5cf   :  { %v947_v53 = vsub.f32 %v2895_v46, %v945_v48 }
 0x5d1   :  { %v949_v0 = vmul.f32 %v947_v53, %v947_v53 }
 0x5d3   :  { %v951_v54 = vsel %vm156_vm0, %v949_v0, 0.0 }
 0x5d4   :  { %952 = vadd.xlane.f32.xlu0 %v951_v54  ;;  %v944_v55 = vpop.xlane.xlu2 %943  ;;  %v144_v54 = vld [vmem:[%s3351_s9 + $0x28] sm:$0xff] }
 0x5d5   :  { %v946_v56 = vmul.f32 %v944_v55, %v2662_v10  ;;  %1132 = vmatpush.msrb.mxu3 %v144_v54 }
 0x5d7   :  { %v948_v57 = vsub.f32 %v2900_v51, %v946_v56 }
 0x5d9   :  { %v950_v2 = vmul.f32 %v948_v57, %v948_v57 }
 0x5db   :  { %v954_v61 = vsel %vm156_vm0, %v950_v2, 0.0  ;;  %v143_v2 = vld [vmem:[%s3351_s9 + $0x20] sm:$0xff] }
 0x5dc   :  { %955 = vadd.xlane.f32.xlu1 %v954_v61  ;;  %1133 = vmatpush.msrb.mxu3 %v143_v2 }
 0x5de   :  { %1134 = vmatpush.msrb.mxu3 %v142_v1 }
 0x647   :  { %v953_v5 = vpop.xlane.xlu0 %952 }
 0x648   :  { %v957_v6 = vmul.f32 %v953_v5, %v2662_v10 }
 0x64a   :  { %v959_v7 = vadd.f32 1e-06, %v957_v6 }
 0x64c   :  { %2355 = vrsqrt.f32 %v959_v7  ;;  %vm967_vm1 = vweird.f32 %v959_v7 }
 0x64f   :  { %v956_v8 = vpop.xlane.xlu1 %955 }
 0x650   :  { %v958_v9 = vmul.f32 %v956_v8, %v2662_v10 }
 0x652   :  { %v2356_v11 = vpop.eup %2355  ;;  %v960_v52 = vadd.f32 1e-06, %v958_v9 }
 0x653   :  { %v962_v21 = vmul.f32 %v2356_v11, %v959_v7  ;;  %vm968_vm15 = vweird.f32 %v2356_v11  ;;  %v141_v7 = vld [vmem:[%s3351_s9 + $0x10] sm:$0xff] }
 0x654   :  { %2357 = vrsqrt.f32 %v960_v52  ;;  %vm969_vm2 = vmor %vm967_vm1, %vm968_vm15  ;;  %vm977_vm4 = vweird.f32 %v960_v52  ;;  %1135 = vmatpush.msrb.mxu3 %v141_v7  ;;  %vm1115_vm1 = vcmask 523264  }
 0x655   :  { %v963_v59 = vmul.f32 %v2356_v11, %v962_v21  ;;  %2359 = vrcp.f32 %v2567_v31  ;;  %v140_v21 = vld [vmem:[%s3351_s9 + $0x8] sm:$0xff] }
 0x656   :  { %1136 = vmatpush.msrb.mxu3 %v140_v21 }
 0x657   :  { %v964_v14 = vmul.f32 0.5, %v963_v59 }
 0x659   :  { %v965_v15 = vsub.f32 1.5, %v964_v14 }
 0x65a   :  { %v2358_v17 = vpop.eup %2357 }
 0x65b   :  { %v966_v12 = vmul.f32 %v2356_v11, %v965_v15  ;;  %v972_v18 = vmul.f32 %v2358_v17, %v960_v52  ;;  %vm978_vm3 = vweird.f32 %v2358_v17  ;;  %v2360_v40 = vpop.eup %2359 }
 0x65c   :  { %vm979_vm5 = vmor %vm977_vm4, %vm978_vm3  ;;  %v1022_v32 = vmul.f32 1.4142135, %v2360_v40  ;;  %vm1026_vm6 = vweird.f32 %v2360_v40 }
 0x65d   :  { %v970_v20 = vsel %vm969_vm2, %v2356_v11, %v966_v12  ;;  %v973_v22 = vmul.f32 %v2358_v17, %v972_v18 }
 0x65e   :  { %v981_v25 = vmul.f32 %v970_v20, %v947_v53  ;;  %v1023_v33 = vsub.f32 1.0, %v1022_v32 }
 0x65f   :  { %v974_v23 = vmul.f32 0.5, %v973_v22 }
 0x660   :  { %v984_v13 = vmul.f32 %v983_v19, %v981_v25  ;;  %v1024_v34 = vmul.f32 %v2360_v40, %v1023_v33 }
 0x661   :  { %v975_v26 = vsub.f32 1.5, %v974_v23 }
 0x662   :  { %v987_v27 = vadd.f32 %v986_v24, %v984_v13  ;;  %v1025_v60 = vadd.f32 %v2360_v40, %v1024_v34 }
 0x663   :  { %v976_v28 = vmul.f32 %v2358_v17, %v975_v26 }
 0x664   :  { %2226 = vmatmul.msk.f32.vlgmr.msrb.gmra.mxu0 %vm156_vm0, %v987_v27  ;;  %v2928_v38 = vsel %vm1026_vm6, %v2360_v40, %v1025_v60 }
 0x665   :  { %v980_v29 = vsel %vm979_vm5, %v2358_v17, %v976_v28  ;;  %v139_v17 = vld [vmem:[%s3351_s9] sm:$0xff] }
 0x666   :  { %v982_v30 = vmul.f32 %v980_v29, %v948_v57  ;;  %1137 = vmatpush.msrb.mxu3 %v139_v17 }
 0x668   :  { %v985_v3 = vmul.f32 %v983_v19, %v982_v30 }
 0x66a   :  { %v988_v36 = vadd.f32 %v986_v24, %v985_v3 }
 0x66c   :  { %2227 = vmatmul.msk.f32.gmra.mxu0 %vm156_vm0, %v988_v36 }
 0x6e1   :  { %v1013_v37 = vpop.f32.mrf.mxu0 }
 0x6e2   :  { %v2930_v39 = vadd.f32 %v1013_v37, %v989_v58 }
 0x6e4   :  { %v2934_v41 = vmul.f32 %v2928_v38, %v2930_v39  ;;  %v1019_v1 = vmul.f32 0.5, %v2930_v39 }
 0x6e6   :  { %v1030_v43 = vmul.f32 %v2934_v41, %v2934_v41 }
 0x6e8   :  { %v1031_v45 = vmin.f32 %v1030_v43, 16.0 }
 0x6e9   :  { %v1016_v44 = vpop.f32.mrf.mxu0 }
 0x6ea   :  { %v1032_v50 = vmul.f32 2.1237322e-06, %v1031_v45  ;;  %v1043_v42 = vmul.f32 3.8918573e-05, %v1031_v45  ;;  %v2941_v49 = vadd.f32 %v1016_v44, %v989_v58 }
 0x6ec   :  { %v1033_v48 = vadd.f32 0.00028619796, %v1032_v50  ;;  %v1044_v53 = vadd.f32 0.001143296, %v1043_v42  ;;  %v2948_v0 = vmul.f32 %v2928_v38, %v2941_v49 }
 0x6ee   :  { %v1034_v55 = vmul.f32 %v1033_v48, %v1031_v45  ;;  %v1045_v56 = vmul.f32 %v1044_v53, %v1031_v45  ;;  %v1070_v57 = vmul.f32 %v2948_v0, %v2948_v0 }
 0x6f0   :  { %v1046_v61 = vadd.f32 0.014752088, %v1045_v56  ;;  %v1071_v62 = vmin.f32 %v1070_v57, 16.0  ;;  %v1035_v63 = vadd.f32 0.0036580483, %v1034_v55 }
 0x6f2   :  { %v1047_v4 = vmul.f32 %v1046_v61, %v1031_v45  ;;  %v1072_v5 = vmul.f32 2.1237322e-06, %v1071_v62  ;;  %v1083_v6 = vmul.f32 3.8918573e-05, %v1071_v62  ;;  %v1036_v11 = vmul.f32 %v1035_v63, %v1031_v45 }
 0x6f4   :  { %v1048_v8 = vadd.f32 0.112945676, %v1047_v4  ;;  %v1073_v9 = vadd.f32 0.00028619796, %v1072_v5  ;;  %v1084_v52 = vadd.f32 0.001143296, %v1083_v6 }
 0x6f5   :  { %v1037_v18 = vadd.f32 0.05243302, %v1036_v11 }
 0x6f6   :  { %v1049_v59 = vmul.f32 %v1048_v8, %v1031_v45  ;;  %v1074_v14 = vmul.f32 %v1073_v9, %v1071_v62  ;;  %v1085_v15 = vmul.f32 %v1084_v52, %v1071_v62  ;;  %v1020_v52 = vmul.f32 0.5, %v2941_v49 }
 0x6f7   :  { %v1038_v23 = vmul.f32 %v1037_v18, %v1031_v45 }
 0x6f8   :  { %v1050_v12 = vadd.f32 0.4994258, %v1049_v59  ;;  %v1086_v19 = vadd.f32 0.014752088, %v1085_v15  ;;  %v1075_v22 = vadd.f32 0.0036580483, %v1074_v14 }
 0x6f9   :  { %v1039_v28 = vadd.f32 0.18741608, %v1038_v23  ;;  %v155_v59 = vld [vmem:[%s3352_s10] sm:$0x3] }
 0x6fa   :  { %v1051_v20 = vmul.f32 %v1050_v12, %v1031_v45  ;;  %v1087_v24 = vmul.f32 %v1086_v19, %v1071_v62  ;;  %v1076_v26 = vmul.f32 %v1075_v22, %v1071_v62  ;;  %v1114_v14 = vperm.slane %v155_v59, 0 }
 0x6fb   :  { %v1040_v31 = vmul.f32 %v1039_v28, %v1031_v45 }
 0x6fc   :  { %v1052_v25 = vadd.f32 1.0, %v1051_v20  ;;  %v1088_v13 = vadd.f32 0.112945676, %v1087_v24  ;;  %v1077_v30 = vadd.f32 0.05243302, %v1076_v26 }
 0x6fd   :  { %v1041_v60 = vadd.f32 1.1283791, %v1040_v31 }
 0x6fe   :  { %2361 = vrcp.f32 %v1052_v25  ;;  %v1089_v27 = vmul.f32 %v1088_v13, %v1071_v62  ;;  %v1078_v33 = vmul.f32 %v1077_v30, %v1071_v62  ;;  %v1064_v35 = vand.u32 2147483648, %v1052_v25  ;;  %v118_v30 = vld [vmem:[%s3345_s3 + $0x30] sm:$0xff] }
 0x6ff   :  { %v1062_v37 = vand.u32 2147483647, %v1052_v25  ;;  %vm1058_vm9 = vweird.f32 %v1052_v25  ;;  %v1042_v42 = vmul.f32 %v1041_v60, %v2934_v41 }
 0x700   :  { %v1090_v29 = vadd.f32 0.4994258, %v1089_v27  ;;  %v1079_v43 = vadd.f32 0.18741608, %v1078_v33  ;;  %v1065_v47 = vor.u32 1.1754944e-38, %v1064_v35 }
 0x701   :  { %vm1063_vm11 = vcmp.eq.f32.partialorder %v1062_v37, 8.507059e+37 }
 0x702   :  { %v1091_v3 = vmul.f32 %v1090_v29, %v1071_v62  ;;  %v1080_v48 = vmul.f32 %v1079_v43, %v1071_v62  ;;  %v119_v29 = vld [vmem:[%s3345_s3 + $0x38] sm:$0xff] }
 0x703   :  { %1216 = vmatpush.msra.mxu1 %v119_v29 }
 0x704   :  { %v2362_v36 = vpop.eup %2361  ;;  %v1092_v32 = vadd.f32 1.0, %v1091_v3  ;;  %v1081_v2 = vadd.f32 1.1283791, %v1080_v48  ;;  %v117_v3 = vld [vmem:[%s3345_s3 + $0x28] sm:$0xff] }
 0x705   :  { %v1054_v40 = vmul.f32 %v2362_v36, %v1052_v25  ;;  %vm1059_vm7 = vweird.f32 %v2362_v36  ;;  %1217 = vmatpush.msra.mxu1 %v118_v30 }
 0x706   :  { %2363 = vrcp.f32 %v1092_v32  ;;  %vm1060_vm10 = vmor %vm1058_vm9, %vm1059_vm7  ;;  %v1104_v57 = vand.u32 2147483648, %v1092_v32  ;;  %v1102_v63 = vand.u32 2147483647, %v1092_v32  ;;  %vm1098_vm15 = vweird.f32 %v1092_v32 }
 0x707   :  { %v1055_v34 = vsub.f32 1.0, %v1054_v40  ;;  %v1082_v62 = vmul.f32 %v1081_v2, %v2948_v0  ;;  %1218 = vmatpush.msra.mxu1 %v117_v3 }
 0x708   :  { %v1105_v6 = vor.u32 1.1754944e-38, %v1104_v57  ;;  %vm1103_vm3 = vcmp.eq.f32.partialorder %v1102_v63, 8.507059e+37 }
 0x709   :  { %v1056_v58 = vmul.f32 %v2362_v36, %v1055_v34 }
 0x70b   :  { %v1057_v44 = vadd.f32 %v2362_v36, %v1056_v58 }
 0x70c   :  { %v2364_v50 = vpop.eup %2363 }
 0x70d   :  { %v1061_v16 = vsel %vm1060_vm10, %v2362_v36, %v1057_v44  ;;  %v1094_v53 = vmul.f32 %v2364_v50, %v1092_v32  ;;  %vm1099_vm12 = vweird.f32 %v2364_v50  ;;  %v116_v36 = vld [vmem:[%s3345_s3 + $0x20] sm:$0xff]  ;;  %v3009_v44 = vld [vmem:[#allocation5 + $0x2] sm:$0x3] }
 0x70e   :  { %v1066_v45 = vsel %vm1063_vm11, %v1065_v47, %v1061_v16  ;;  %vm1100_vm2 = vmor %vm1098_vm15, %vm1099_vm12  ;;  %1219 = vmatpush.msra.mxu1 %v116_v36  ;;  %v3011_v16 = vld [vmem:[#allocation7 + $0x2] sm:$0x3] }
 0x70f   :  { %v1067_v54 = vmul.f32 %v1066_v45, %v1042_v42  ;;  %v1095_v55 = vsub.f32 1.0, %v1094_v53  ;;  %v1191_v45 = vperm.slane %v3009_v44, 0 }
 0x711   :  { %v2228_v56 = vclamps-f32 %v1067_v54, 1.0  ;;  %v1096_v61 = vmul.f32 %v2364_v50, %v1095_v55 }
 0x713   :  { %v1110_v4 = vadd.f32 1.0, %v2228_v56  ;;  %v1097_v5 = vadd.f32 %v2364_v50, %v1096_v61  ;;  %v1194_v56 = vperm.slane %v3011_v16, 0 }
 0x715   :  { %v1112_v41 = vmul.f32 %v1110_v4, %v1019_v1  ;;  %v1101_v7 = vsel %vm1100_vm2, %v2364_v50, %v1097_v5 }
 0x716   :  { %v1106_v8 = vsel %vm1103_vm3, %v1105_v6, %v1101_v7 }
 0x717   :  { %2230 = vmatmul.msk.f32.vlgmr.msrb.gmra.mxu3 %vm1115_vm1, %v1112_v41  ;;  %v1107_v9 = vmul.f32 %v1106_v8, %v1082_v62  ;;  %v2413_v62 = vld [vmem:[%s3346_s4] sm:$0x3]  ;;  %s3367_s4 = smov 16  }
 0x718   :  { %v1197_v7 = vperm.slane %v2413_v62, 1 }
 0x719   :  { %v2229_v11 = vclamps-f32 %v1107_v9, 1.0 }
 0x71b   :  { %v1111_v21 = vadd.f32 1.0, %v2229_v11 }
 0x71d   :  { %v1113_v39 = vmul.f32 %v1111_v21, %v1020_v52 }
 0x71f   :  { %2231 = vmatmul.msk.f32.gmra.mxu3 %vm1115_vm1, %v1113_v39 }
 0x79a   :  { %v1139_v15 = vpop.f32.mrf.mxu3 }
 0x79b   :  { %v1140_v0 = vadd.f32 %v1139_v15, %v1114_v14 }
 0x79d   :  { %v2980_v17 = vadd.f32 %v1140_v0, %v2895_v46 }
 0x79f   :  { %v1147_v12 = vsel %vm156_vm0, %v2980_v17, 0.0 }
 0x7a0   :  { %1148 = vadd.xlane.f32.xlu2 %v1147_v12 }
 0x7a2   :  { %v1142_v18 = vpop.f32.mrf.mxu3 }
 0x7a3   :  { %v1143_v49 = vadd.f32 %v1142_v18, %v1114_v14 }
 0x7a5   :  { %v2985_v19 = vadd.f32 %v1143_v49, %v2900_v51 }
 0x7a7   :  { %v1150_v20 = vsel %vm156_vm0, %v2985_v19, 0.0 }
 0x7a8   :  { %1151 = vadd.xlane.f32.xlu0 %v1150_v20 }
 0x813   :  { %v1149_v22 = vpop.xlane.xlu2 %1148 }
 0x814   :  { %v1153_v24 = vmul.f32 %v1149_v22, %v2662_v10 }
 0x816   :  { %v1155_v25 = vsub.f32 %v2980_v17, %v1153_v24 }
 0x818   :  { %v1157_v46 = vmul.f32 %v1155_v25, %v1155_v25 }
 0x81a   :  { %v1159_v23 = vsel %vm156_vm0, %v1157_v46, 0.0 }
 0x81b   :  { %1160 = vadd.xlane.f32.xlu1 %v1159_v23  ;;  %v1152_v13 = vpop.xlane.xlu0 %1151 }
 0x81c   :  { %v1154_v26 = vmul.f32 %v1152_v13, %v2662_v10 }
 0x81e   :  { %v1156_v27 = vsub.f32 %v2985_v19, %v1154_v26 }
 0x820   :  { %v1158_v51 = vmul.f32 %v1156_v27, %v1156_v27 }
 0x822   :  { %v1162_v28 = vsel %vm156_vm0, %v1158_v51, 0.0 }
 0x823   :  { %1163 = vadd.xlane.f32.xlu2 %v1162_v28 }
 0x88e   :  { %v1161_v31 = vpop.xlane.xlu1 %1160 }
 0x88f   :  { %v1165_v40 = vmul.f32 %v1161_v31, %v2662_v10 }
 0x891   :  { %v1167_v32 = vadd.f32 1e-06, %v1165_v40 }
 0x893   :  { %2365 = vrsqrt.f32 %v1167_v32  ;;  %vm1175_vm5 = vweird.f32 %v1167_v32 }
 0x896   :  { %v1164_v33 = vpop.xlane.xlu2 %1163 }
 0x897   :  { %v1166_v34 = vmul.f32 %v1164_v33, %v2662_v10 }
 0x899   :  { %v2366_v35 = vpop.eup %2365  ;;  %v1168_v58 = vadd.f32 1e-06, %v1166_v34 }
 0x89a   :  { %v1170_v60 = vmul.f32 %v2366_v35, %v1167_v32  ;;  %vm1176_vm4 = vweird.f32 %v2366_v35 }
 0x89b   :  { %2367 = vrsqrt.f32 %v1168_v58  ;;  %vm1177_vm6 = vmor %vm1175_vm5, %vm1176_vm4  ;;  %vm1185_vm9 = vweird.f32 %v1168_v58 }
 0x89c   :  { %v1171_v37 = vmul.f32 %v2366_v35, %v1170_v60 }
 0x89e   :  { %v1172_v43 = vmul.f32 0.5, %v1171_v37 }
 0x8a0   :  { %v1173_v47 = vsub.f32 1.5, %v1172_v43 }
 0x8a1   :  { %v2368_v50 = vpop.eup %2367 }
 0x8a2   :  { %v1174_v42 = vmul.f32 %v2366_v35, %v1173_v47  ;;  %v1180_v48 = vmul.f32 %v2368_v50, %v1168_v58  ;;  %vm1186_vm7 = vweird.f32 %v2368_v50 }
 0x8a3   :  { %vm1187_vm10 = vmor %vm1185_vm9, %vm1186_vm7 }
 0x8a4   :  { %v1178_v53 = vsel %vm1177_vm6, %v2366_v35, %v1174_v42  ;;  %v1181_v55 = vmul.f32 %v2368_v50, %v1180_v48 }
 0x8a5   :  { %v1189_v54 = vmul.f32 %v1178_v53, %v1155_v25 }
 0x8a6   :  { %v1182_v2 = vmul.f32 0.5, %v1181_v55 }
 0x8a7   :  { %v1192_v57 = vmul.f32 %v1191_v45, %v1189_v54 }
 0x8a8   :  { %v1183_v61 = vsub.f32 1.5, %v1182_v2 }
 0x8a9   :  { %v1195_v63 = vadd.f32 %v1194_v56, %v1192_v57 }
 0x8aa   :  { %v1184_v1 = vmul.f32 %v2368_v50, %v1183_v61 }
 0x8ab   :  { %2232 = vmatmul.msk.f32.vlgmr.msra.gmra.mxu1 %vm156_vm0, %v1195_v63 }
 0x8ac   :  { %v1188_v4 = vsel %vm1187_vm10, %v2368_v50, %v1184_v1 }
 0x8ad   :  { %v1190_v5 = vmul.f32 %v1188_v4, %v1156_v27 }
 0x8af   :  { %v1193_v41 = vmul.f32 %v1191_v45, %v1190_v5 }
 0x8b1   :  { %v1196_v6 = vadd.f32 %v1194_v56, %v1193_v41 }
 0x8b3   :  { %2233 = vmatmul.msk.f32.gmra.mxu1 %vm156_vm0, %v1196_v6 }
 0x928   :  { %v1221_v8 = vpop.f32.mrf.mxu1 }
 0x929   :  { %v3020_v9 = vadd.f32 %v1221_v8, %v1197_v7 }
 0x92b   :  { %1228 = vrot.lane.b32.xlu0 %v3020_v9, %s2554_s22 }
 0x930   :  { %v1224_v11 = vpop.f32.mrf.mxu1 }
 0x931   :  { %v3024_v52 = vadd.f32 %v1224_v11, %v1197_v7 }
 0x933   :  { %1383 = vrot.lane.b32.xlu0 %v3020_v9, %s2555_s23  ;;  %1413 = vrot.lane.b32.xlu2 %v3024_v52, %s2556_s24  ;;  %v3080_v48 = vpack.i.bf16 %v3024_v52, %v3020_v9 }
 0x934   :  { %1255 = vrot.lane.b32.xlu1 %v3024_v52, %s2554_s22 }
 0x93b   :  { %1411 = vrot.lane.b32.xlu0 %v3024_v52, %s2555_s23  ;;  %1571 = vrot.lane.b32.xlu2 %v3024_v52, %s2560_s27 }
 0x93c   :  { %1385 = vrot.lane.b32.xlu1 %v3020_v9, %s2556_s24 }
 0x943   :  { %1543 = vrot.lane.b32.xlu0 %v3020_v9, %s2560_s27  ;;  %1541 = vrot.lane.b32.xlu2 %v3020_v9, %s2558_s25 }
 0x944   :  { %1569 = vrot.lane.b32.xlu1 %v3024_v52, %s2558_s25 }
 0x94b   :  { %1727 = vrot.lane.b32.xlu0 %v3024_v52, %s2557_s0  ;;  %1701 = vrot.lane.b32.xlu2 %v3020_v9, %s2559_s26 }
 0x94c   :  { %1729 = vrot.lane.b32.xlu1 %v3024_v52, %s2559_s26 }
 0x954   :  { %1699 = vrot.lane.b32.xlu1 %v3020_v9, %s2557_s0 }
 0x98d   :  { %v1414_v21 = vpop.permute.xlu2 %1413 }
 0x98e   :  { %2242 = vmatpush.xpose.msk.msra.mxu3 %vm247_vm8, %v1414_v21 }
 0x995   :  { %v1572_v39 = vpop.permute.xlu2 %1571 }
 0x996   :  { %2248 = vmatpush.xpose.msk.msrb.mxu3 %vm247_vm8, %v1572_v39 }
 0x99d   :  { %v1229_v59 = vpop.permute.xlu0 %1228  ;;  %v1542_v0 = vpop.permute.xlu2 %1541 }
 0x99e   :  { %2234 = vmatpush.xpose.msk.msra.mxu2 %vm247_vm8, %v1229_v59 }
 0x9a1   :  { %2235 = vmatmul.msk.f32.vlgmr.msra.gmra.mxu2 %vm247_vm8, %v3020_v9 }
 0x9a5   :  { %v1384_v14 = vpop.permute.xlu0 %1383  ;;  %v1702_v20 = vpop.permute.xlu2 %1701 }
 0x9a6   :  { %v1256_v15 = vpop.permute.xlu1 %1255 }
 0x9a7   :  { %2236 = vmatpush.xpose.msk.msra.mxu0 %vm247_vm8, %v1256_v15 }
 0x9aa   :  { %2237 = vmatmul.msk.f32.vlgmr.msra.gmra.mxu0 %vm247_vm8, %v3024_v52 }
 0x9ad   :  { %v1412_v12 = vpop.permute.xlu0 %1411 }
 0x9ae   :  { %v1386_v18 = vpop.permute.xlu1 %1385  ;;  %2243 = vmatmul.msk.f32.vlgmr.msra.gmra.mxu3 %vm247_vm8, %v1412_v12 }
 0x9af   :  { %2240 = vmatpush.xpose.msk.msrb.mxu0 %vm247_vm8, %v1386_v18 }
 0x9b2   :  { %2241 = vmatmul.msk.f32.vlgmr.msrb.gmra.mxu0 %vm247_vm8, %v1384_v14 }
 0x9b5   :  { %v1544_v49 = vpop.permute.xlu0 %1543 }
 0x9b6   :  { %v1570_v22 = vpop.permute.xlu1 %1569  ;;  %2246 = vmatpush.xpose.msk.msra.mxu0 %vm247_vm8, %v1544_v49 }
 0x9b7   :  { %2249 = vmatmul.msk.f32.vlgmr.msrb.gmra.mxu3 %vm247_vm8, %v1570_v22 }
 0x9ba   :  { %2252 = vmatpush.xpose.msk.msrb.mxu0 %vm247_vm8, %v1702_v20 }
 0x9bb   :  { %2247 = vmatmul.msk.f32.vlgmr.msra.gmra.mxu0 %vm247_vm8, %v1542_v0 }
 0x9bd   :  { %v1728_v25 = vpop.permute.xlu0 %1727 }
 0x9be   :  { %v1730_v24 = vpop.permute.xlu1 %1729 }
 0x9bf   :  { %2254 = vmatpush.xpose.msk.msra.mxu3 %vm247_vm8, %v1730_v24 }
 0x9c2   :  { %2255 = vmatmul.msk.f32.vlgmr.msra.gmra.mxu3 %vm247_vm8, %v1728_v25 }
 0x9c6   :  { %v1700_v46 = vpop.permute.xlu1 %1699 }
 0x9c7   :  { %2253 = vmatmul.msk.f32.vlgmr.msrb.gmra.mxu0 %vm247_vm8, %v1700_v46 }
 0xa24   :  { %v1251_v23 = vpop.f32.mrf.mxu2 }
 0xa25   :  { %v1281_v13 = vmul.f32 0.35355338, %v1251_v23 }
 0xa27   :  { %v1278_v26 = vpop.f32.mrf.mxu0  ;;  %v1283_v27 = vsel %vm247_vm8, %v1281_v13, -inf }
 0xa28   :  { %v1282_v51 = vmul.f32 0.35355338, %v1278_v26  ;;  %1284 = vmax.xlane.f32.xlu0 %v1283_v27 }
 0xa2a   :  { %v1286_v28 = vsel %vm247_vm8, %v1282_v51, -inf }
 0xa2b   :  { %1287 = vmax.xlane.f32.xlu2 %v1286_v28 }
 0xa2f   :  { %v1408_v29 = vpop.f32.mrf.mxu0 }
 0xa30   :  { %v1439_v30 = vmul.f32 0.35355338, %v1408_v29 }
 0xa31   :  { %v1436_v3 = vpop.f32.mrf.mxu3 }
 0xa32   :  { %v1440_v36 = vmul.f32 0.35355338, %v1436_v3  ;;  %v1441_v31 = vsel %vm247_vm8, %v1439_v30, -inf }
 0xa33   :  { %1442 = vmax.xlane.f32.xlu1 %v1441_v31 }
 0xa34   :  { %v1444_v40 = vsel %vm247_vm8, %v1440_v36, -inf }
 0xa35   :  { %1445 = vmax.xlane.f32.xlu0 %v1444_v40 }
 0xa38   :  { %v1566_v32 = vpop.f32.mrf.mxu0 }
 0xa39   :  { %v1597_v33 = vmul.f32 0.35355338, %v1566_v32 }
 0xa3a   :  { %v1594_v34 = vpop.f32.mrf.mxu3 }
 0xa3b   :  { %v1599_v35 = vsel %vm247_vm8, %v1597_v33, -inf  ;;  %v1598_v60 = vmul.f32 0.35355338, %v1594_v34 }
 0xa3c   :  { %1600 = vmax.xlane.f32.xlu2 %v1599_v35 }
 0xa3d   :  { %v1602_v58 = vsel %vm247_vm8, %v1598_v60, -inf }
 0xa3e   :  { %1603 = vmax.xlane.f32.xlu1 %v1602_v58 }
 0xa44   :  { %v1724_v37 = vpop.f32.mrf.mxu0 }
 0xa45   :  { %v1755_v43 = vmul.f32 0.35355338, %v1724_v37  ;;  %v1752_v47 = vpop.f32.mrf.mxu3 }
 0xa46   :  { %v1756_v50 = vmul.f32 0.35355338, %v1752_v47 }
 0xa47   :  { %v1757_v42 = vsel %vm247_vm8, %v1755_v43, -inf }
 0xa48   :  { %1758 = vmax.xlane.f32.xlu0 %v1757_v42  ;;  %v1760_v45 = vsel %vm247_vm8, %v1756_v50, -inf }
 0xa49   :  { %1761 = vmax.xlane.f32.xlu2 %v1760_v45 }
 0xa57   :  { %2296 = vrot.lane.b32.xlu1 %v3080_v48, %s2561_s28 }
 0xa9b   :  { %v1285_v53 = vpop.xlane.xlu0 %1284 }
 0xa9c   :  { %v1289_v54 = vsub.f32 %v1281_v13, %v1285_v53 }
 0xa9e   :  { %v1291_v55 = vmul.f32 1.442695, %v1289_v54  ;;  %v1288_v56 = vpop.xlane.xlu2 %1287 }
 0xa9f   :  { %v1290_v57 = vsub.f32 %v1282_v51, %v1288_v56 }
 0xaa0   :  { %2369 = vpow2.f32 %v1291_v55 }
 0xaa1   :  { %v1293_v2 = vmul.f32 1.442695, %v1290_v57 }
 0xaa3   :  { %2371 = vpow2.f32 %v1293_v2 }
 0xaa6   :  { %v3084_v61 = vpop.eup %2369  ;;  %v1443_v63 = vpop.xlane.xlu1 %1442 }
 0xaa7   :  { %v1447_v1 = vsub.f32 %v1439_v30, %v1443_v63  ;;  %v1295_v4 = vsel %vm247_vm8, %v3084_v61, 0.0 }
 0xaa8   :  { %v1446_v5 = vpop.xlane.xlu0 %1445  ;;  %1296 = vadd.xlane.f32.xlu1 %v1295_v4 }
 0xaa9   :  { %v3088_v41 = vpop.eup %2371  ;;  %v1449_v6 = vmul.f32 1.442695, %v1447_v1  ;;  %v1448_v62 = vsub.f32 %v1440_v36, %v1446_v5 }
 0xaaa   :  { %v1298_v7 = vsel %vm247_vm8, %v3088_v41, 0.0 }
 0xaab   :  { %2373 = vpow2.f32 %v1449_v6  ;;  %v1451_v8 = vmul.f32 1.442695, %v1448_v62  ;;  %1299 = vadd.xlane.f32.xlu0 %v1298_v7 }
 0xaad   :  { %2375 = vpow2.f32 %v1451_v8 }
 0xaaf   :  { %v1601_v9 = vpop.xlane.xlu2 %1600 }
 0xab0   :  { %v1605_v11 = vsub.f32 %v1597_v33, %v1601_v9 }
 0xab1   :  { %v3092_v52 = vpop.eup %2373  ;;  %v1604_v39 = vpop.xlane.xlu1 %1603 }
 0xab2   :  { %v1607_v21 = vmul.f32 1.442695, %v1605_v11  ;;  %v1606_v59 = vsub.f32 %v1598_v60, %v1604_v39  ;;  %v1453_v14 = vsel %vm247_vm8, %v3092_v52, 0.0 }
 0xab3   :  { %v3096_v15 = vpop.eup %2375  ;;  %1454 = vadd.xlane.f32.xlu2 %v1453_v14 }
 0xab4   :  { %2377 = vpow2.f32 %v1607_v21  ;;  %v1609_v0 = vmul.f32 1.442695, %v1606_v59  ;;  %v1456_v12 = vsel %vm247_vm8, %v3096_v15, 0.0 }
 0xab5   :  { %1457 = vadd.xlane.f32.xlu1 %v1456_v12 }
 0xab6   :  { %2379 = vpow2.f32 %v1609_v0 }
 0xaba   :  { %v3100_v18 = vpop.eup %2377 }
 0xabb   :  { %v1611_v49 = vsel %vm247_vm8, %v3100_v18, 0.0  ;;  %v1759_v20 = vpop.xlane.xlu0 %1758 }
 0xabc   :  { %1612 = vadd.xlane.f32.xlu0 %v1611_v49  ;;  %v3104_v22 = vpop.eup %2379  ;;  %v1763_v24 = vsub.f32 %v1755_v43, %v1759_v20  ;;  %v1762_v25 = vpop.xlane.xlu2 %1761 }
 0xabd   :  { %v1764_v46 = vsub.f32 %v1756_v50, %v1762_v25  ;;  %v1614_v23 = vsel %vm247_vm8, %v3104_v22, 0.0 }
 0xabe   :  { %v1765_v13 = vmul.f32 1.442695, %v1763_v24  ;;  %1615 = vadd.xlane.f32.xlu2 %v1614_v23 }
 0xabf   :  { %v1767_v26 = vmul.f32 1.442695, %v1764_v46 }
 0xac0   :  { %2381 = vpow2.f32 %v1765_v13 }
 0xac1   :  { %2383 = vpow2.f32 %v1767_v26 }
 0xac6   :  { %v3108_v27 = vpop.eup %2381 }
 0xac7   :  { %v3110_v51 = vpop.eup %2383  ;;  %v1769_v28 = vsel %vm247_vm8, %v3108_v27, 0.0 }
 0xac8   :  { %1770 = vadd.xlane.f32.xlu0 %v1769_v28  ;;  %v1772_v29 = vsel %vm247_vm8, %v3110_v51, 0.0 }
 0xac9   :  { %1773 = vadd.xlane.f32.xlu2 %v1772_v29  ;;  %v2297_v30 = vpop.permute.xlu1 %2296 }
 0xaca   :  { %v2299_v3 = vunpack.i.h.bf16 %v2297_v30  ;;  %v2298_v36 = vunpack.i.l.bf16 %v2297_v30 }
 0xacc   :  { %1352 = vmatpush.msrb.mxu1 %v2298_v36  ;;  %1378 = vmatpush.msrb.mxu2 %v2299_v3 }
 0xace   :  { %2311 = vrot.lane.b32.xlu1 %v3080_v48, %s2564_s8 }
 0xadc   :  { %2301 = vrot.lane.b32.xlu0 %v3080_v48, %s2562_s29 }
 0xae1   :  { %2306 = vrot.lane.b32.xlu2 %v3080_v48, %s2563_s2 }
 0xb1b   :  { %v1297_v31 = vpop.xlane.xlu1 %1296 }
 0xb1c   :  { %2385 = vrcp.f32 %v1297_v31  ;;  %v1312_v60 = vand.u32 2147483648, %v1297_v31  ;;  %v1310_v43 = vand.u32 2147483647, %v1297_v31  ;;  %vm1306_vm12 = vweird.f32 %v1297_v31 }
 0xb1e   :  { %v1300_v40 = vpop.xlane.xlu0 %1299  ;;  %v1313_v45 = vor.u32 1.1754944e-38, %v1312_v60  ;;  %vm1311_vm3 = vcmp.eq.f32.partialorder %v1310_v43, 8.507059e+37 }
 0xb1f   :  { %2387 = vrcp.f32 %v1300_v40  ;;  %v1326_v42 = vand.u32 2147483648, %v1300_v40  ;;  %v1324_v53 = vand.u32 2147483647, %v1300_v40  ;;  %vm1320_vm4 = vweird.f32 %v1300_v40 }
 0xb21   :  { %v1327_v57 = vor.u32 1.1754944e-38, %v1326_v42  ;;  %vm1325_vm6 = vcmp.eq.f32.partialorder %v1324_v53, 8.507059e+37 }
 0xb22   :  { %v2386_v32 = vpop.eup %2385 }
 0xb23   :  { %v1302_v33 = vmul.f32 %v2386_v32, %v1297_v31  ;;  %vm1307_vm11 = vweird.f32 %v2386_v32 }
 0xb24   :  { %vm1308_vm15 = vmor %vm1306_vm12, %vm1307_vm11 }
 0xb25   :  { %v2388_v34 = vpop.eup %2387  ;;  %v1303_v35 = vsub.f32 1.0, %v1302_v33 }
 0xb26   :  { %v1316_v58 = vmul.f32 %v2388_v34, %v1300_v40  ;;  %vm1321_vm2 = vweird.f32 %v2388_v34  ;;  %v1455_v2 = vpop.xlane.xlu2 %1454 }
 0xb27   :  { %v1304_v37 = vmul.f32 %v2386_v32, %v1303_v35  ;;  %vm1322_vm5 = vmor %vm1320_vm4, %vm1321_vm2  ;;  %2389 = vrcp.f32 %v1455_v2  ;;  %v1470_v26 = vand.u32 2147483648, %v1455_v2  ;;  %vm1464_vm10 = vweird.f32 %v1455_v2 }
 0xb28   :  { %v1317_v47 = vsub.f32 1.0, %v1316_v58  ;;  %v1458_v4 = vpop.xlane.xlu1 %1457  ;;  %v1468_v30 = vand.u32 2147483647, %v1455_v2 }
 0xb29   :  { %v1305_v50 = vadd.f32 %v2386_v32, %v1304_v37  ;;  %2391 = vrcp.f32 %v1458_v4  ;;  %v1484_v3 = vand.u32 2147483648, %v1458_v4  ;;  %vm1478_vm12 = vweird.f32 %v1458_v4 }
 0xb2a   :  { %v1318_v48 = vmul.f32 %v2388_v34, %v1317_v47  ;;  %v1482_v36 = vand.u32 2147483647, %v1458_v4  ;;  %v1471_v33 = vor.u32 1.1754944e-38, %v1470_v26  ;;  %vm1469_vm2 = vcmp.eq.f32.partialorder %v1468_v30, 8.507059e+37 }
 0xb2b   :  { %v1309_v54 = vsel %vm1308_vm15, %v2386_v32, %v1305_v50  ;;  %v1485_v58 = vor.u32 1.1754944e-38, %v1484_v3 }
 0xb2c   :  { %v1314_v55 = vsel %vm1311_vm3, %v1313_v45, %v1309_v54  ;;  %v1319_v56 = vadd.f32 %v2388_v34, %v1318_v48  ;;  %vm1483_vm3 = vcmp.eq.f32.partialorder %v1482_v36, 8.507059e+37 }
 0xb2d   :  { %v1329_v63 = vmul.f32 %v3084_v61, %v1314_v55  ;;  %v2390_v8 = vpop.eup %2389 }
 0xb2e   :  { %v1323_v1 = vsel %vm1322_vm5, %v2388_v34, %v1319_v56  ;;  %v1460_v61 = vmul.f32 %v2390_v8, %v1455_v2  ;;  %vm1465_vm7 = vweird.f32 %v2390_v8 }
 0xb2f   :  { %v1328_v5 = vsel %vm1325_vm6, %v1327_v57, %v1323_v1  ;;  %2238 = vmatmul.msk.f32.vlgmr.msrb.gmra.mxu1 %vm247_vm8, %v1329_v63  ;;  %v3126_v62 = vpop.xlane.xlu0 %1612  ;;  %v2392_v9 = vpop.eup %2391  ;;  %vm1466_vm11 = vmor %vm1464_vm10, %vm1465_vm7 }
 0xb30   :  { %v1330_v6 = vmul.f32 %v3088_v41, %v1328_v5  ;;  %2393 = vrcp.f32 %v3126_v62  ;;  %v1474_v11 = vmul.f32 %v2392_v9, %v1458_v4  ;;  %v1461_v39 = vsub.f32 1.0, %v1460_v61 }
 0xb31   :  { %v3128_v7 = vpop.xlane.xlu2 %1615  ;;  %vm1479_vm9 = vweird.f32 %v2392_v9  ;;  %vm1622_vm6 = vweird.f32 %v3126_v62  ;;  %v1628_v42 = vand.u32 2147483648, %v3126_v62  ;;  %v1626_v1 = vand.u32 2147483647, %v3126_v62 }
 0xb32   :  { %2239 = vmatmul.msk.f32.vlgmr.msrb.gmra.mxu2 %vm247_vm8, %v1330_v6  ;;  %2395 = vrcp.f32 %v3128_v7  ;;  %v1475_v14 = vsub.f32 1.0, %v1474_v11  ;;  %v1462_v12 = vmul.f32 %v2390_v8, %v1461_v39  ;;  %vm1480_vm15 = vmor %vm1478_vm12, %vm1479_vm9  ;;  %vm1636_vm9 = vweird.f32 %v3128_v7 }
 0xb33   :  { %v1642_v56 = vand.u32 2147483648, %v3128_v7  ;;  %v1640_v5 = vand.u32 2147483647, %v3128_v7 }
 0xb34   :  { %v1476_v24 = vmul.f32 %v2392_v9, %v1475_v14  ;;  %v1463_v25 = vadd.f32 %v2390_v8, %v1462_v12 }
 0xb35   :  { %vm1641_vm12 = vcmp.eq.f32.partialorder %v1640_v5, 8.507059e+37 }
 0xb36   :  { %v3132_v21 = vpop.eup %2393  ;;  %v1477_v28 = vadd.f32 %v2392_v9, %v1476_v24  ;;  %v1467_v31 = vsel %vm1466_vm11, %v2390_v8, %v1463_v25  ;;  %vm1627_vm11 = vcmp.eq.f32.partialorder %v1626_v1, 8.507059e+37 }
 0xb37   :  { %v1618_v49 = vmul.f32 %v3132_v21, %v3126_v62  ;;  %v1472_v37 = vsel %vm1469_vm2, %v1471_v33, %v1467_v31  ;;  %vm1623_vm4 = vweird.f32 %v3132_v21 }
 0xb38   :  { %v3136_v41 = vpop.eup %2395  ;;  %v1481_v34 = vsel %vm1480_vm15, %v2392_v9, %v1477_v28  ;;  %vm3162_vm7 = vmor %vm1622_vm6, %vm1623_vm4  ;;  %v1487_v6 = vmul.f32 %v3092_v52, %v1472_v37  ;;  %v125_v37 = vld [vmem:[%s3347_s5 + $0x20] sm:$0xff] }
 0xb39   :  { %v1632_v20 = vmul.f32 %v3136_v41, %v3128_v7  ;;  %v1619_v46 = vsub.f32 1.0, %v1618_v49  ;;  %v1486_v43 = vsel %vm1483_vm3, %v1485_v58, %v1481_v34  ;;  %vm1637_vm5 = vweird.f32 %v3136_v41  ;;  %v126_v58 = vld [vmem:[%s3347_s5 + $0x28] sm:$0xff] }
 0xb3a   :  { %vm3169_vm10 = vmor %vm1636_vm9, %vm1637_vm5  ;;  %v1488_v8 = vmul.f32 %v3096_v15, %v1486_v43  ;;  %v1629_v15 = vor.u32 1.1754944e-38, %v1628_v42 }
 0xb3b   :  { %v3134_v59 = vpop.xlane.xlu0 %1770  ;;  %v1633_v23 = vsub.f32 1.0, %v1632_v20  ;;  %v1620_v40 = vmul.f32 %v3132_v21, %v1619_v46 }
 0xb3c   :  { %v3138_v0 = vpop.xlane.xlu2 %1773  ;;  %2397 = vrcp.f32 %v3134_v59  ;;  %vm1780_vm3 = vweird.f32 %v3134_v59  ;;  %v1784_v24 = vand.u32 2147483647, %v3134_v59  ;;  %v1786_v25 = vand.u32 2147483648, %v3134_v59 }
 0xb3d   :  { %2399 = vrcp.f32 %v3138_v0  ;;  %v1634_v32 = vmul.f32 %v3136_v41, %v1633_v23  ;;  %v1621_v47 = vadd.f32 %v3132_v21, %v1620_v40  ;;  %v1800_v46 = vand.u32 2147483648, %v3138_v0 }
 0xb3e   :  { %vm1794_vm5 = vweird.f32 %v3138_v0  ;;  %v1798_v23 = vand.u32 2147483647, %v3138_v0 }
 0xb3f   :  { %v1635_v50 = vadd.f32 %v3136_v41, %v1634_v32  ;;  %v1625_v9 = vsel %vm3162_vm7, %v3132_v21, %v1621_v47  ;;  %v1643_v21 = vor.u32 1.1754944e-38, %v1642_v56  ;;  %v1801_v36 = vor.u32 1.1754944e-38, %v1800_v46 }
 0xb40   :  { %v2312_v57 = vpop.permute.xlu1 %2311  ;;  %vm1785_vm7 = vcmp.eq.f32.partialorder %v1784_v24, 8.507059e+37  ;;  %vm1799_vm9 = vcmp.eq.f32.partialorder %v1798_v23, 8.507059e+37  ;;  %v135_v24 = vld [vmem:[%s3349_s7 + $0x28] sm:$0xff] }
 0xb41   :  { %v1639_v61 = vsel %vm3169_vm10, %v3136_v41, %v1635_v50  ;;  %v2314_v14 = vunpack.i.h.bf16 %v2312_v57  ;;  %v2313_v52 = vunpack.i.l.bf16 %v2312_v57  ;;  %v1630_v41 = vsel %vm1627_vm11, %v1629_v15, %v1625_v9 }
 0xb42   :  { %v3146_v13 = vpop.eup %2397  ;;  %v1644_v12 = vsel %vm1641_vm12, %v1643_v21, %v1639_v61  ;;  %v1645_v26 = vmul.f32 %v3100_v18, %v1630_v41 }
 0xb43   :  { %v3148_v29 = vpop.eup %2399  ;;  %v1776_v35 = vmul.f32 %v3146_v13, %v3134_v59  ;;  %vm1781_vm15 = vweird.f32 %v3146_v13  ;;  %v1646_v28 = vmul.f32 %v3104_v22, %v1644_v12  ;;  %v1787_v59 = vor.u32 1.1754944e-38, %v1786_v25  ;;  %v134_v25 = vld [vmem:[%s3349_s7 + $0x20] sm:$0xff] }
 0xb44   :  { %v1790_v60 = vmul.f32 %v3148_v29, %v3138_v0  ;;  %v2307_v53 = vpop.permute.xlu2 %2306  ;;  %vm1795_vm2 = vweird.f32 %v3148_v29  ;;  %vm1782_vm4 = vmor %vm1780_vm3, %vm1781_vm15 }
 0xb45   :  { %v1777_v45 = vsub.f32 1.0, %v1776_v35  ;;  %v2309_v11 = vunpack.i.h.bf16 %v2307_v53  ;;  %v2308_v62 = vunpack.i.l.bf16 %v2307_v53  ;;  %vm1796_vm6 = vmor %vm1794_vm5, %vm1795_vm2 }
 0xb46   :  { %v1791_v48 = vsub.f32 1.0, %v1790_v60  ;;  %v127_v60 = vld [vmem:[%s3347_s5 + $0x30] sm:$0xff] }
 0xb47   :  { %v1778_v39 = vmul.f32 %v3146_v13, %v1777_v45 }
 0xb48   :  { %v1792_v7 = vmul.f32 %v3148_v29, %v1791_v48 }
 0xb49   :  { %v1779_v49 = vadd.f32 %v3146_v13, %v1778_v39 }
 0xb4a   :  { %v1793_v20 = vadd.f32 %v3148_v29, %v1792_v7 }
 0xb4b   :  { %v1783_v30 = vsel %vm1782_vm4, %v3146_v13, %v1779_v49  ;;  %v137_v49 = vld [vmem:[%s3349_s7 + $0x38] sm:$0xff] }
 0xb4c   :  { %v1797_v3 = vsel %vm1796_vm6, %v3148_v29, %v1793_v20  ;;  %v1788_v31 = vsel %vm1785_vm7, %v1787_v59, %v1783_v30  ;;  %1988 = vmatpush.msrb.mxu3 %v137_v49  ;;  %v136_v20 = vld [vmem:[%s3349_s7 + $0x30] sm:$0xff] }
 0xb4d   :  { %v1802_v40 = vsel %vm1799_vm9, %v1801_v36, %v1797_v3  ;;  %v1803_v0 = vmul.f32 %v3108_v27, %v1788_v31 }
 0xb4e   :  { %v2302_v54 = vpop.permute.xlu0 %2301  ;;  %v1804_v18 = vmul.f32 %v3110_v51, %v1802_v40  ;;  %v128_v51 = vld [vmem:[%s3347_s5 + $0x38] sm:$0xff]  ;;  %1989 = vmatpush.msrb.mxu3 %v136_v20 }
 0xb4f   :  { %v2304_v2 = vunpack.i.h.bf16 %v2302_v54  ;;  %v2303_v63 = vunpack.i.l.bf16 %v2302_v54  ;;  %1906 = vmatpush.msra.mxu0 %v128_v51 }
 0xb50   :  { %1990 = vmatpush.msrb.mxu3 %v135_v24 }
 0xb51   :  { %1510 = vmatpush.msra.mxu1 %v2303_v63  ;;  %1536 = vmatpush.msra.mxu2 %v2304_v2  ;;  %v2414_v63 = vld [vmem:[%s3348_s6] sm:$0x3] }
 0xb52   :  { %2244 = vmatmul.msk.f32.vlgmr.msra.gmra.mxu1 %vm247_vm8, %v1487_v6  ;;  %2245 = vmatmul.msk.f32.vlgmr.msra.gmra.mxu2 %vm247_vm8, %v1488_v8  ;;  %v1887_v1 = vperm.slane %v2414_v63, 1 }
 0xb53   :  { %1668 = vmatpush.msrb.mxu1 %v2308_v62  ;;  %1694 = vmatpush.msrb.mxu2 %v2309_v11 }
 0xb54   :  { %1907 = vmatpush.msra.mxu0 %v127_v60  ;;  %1991 = vmatpush.msrb.mxu3 %v134_v25 }
 0xb55   :  { %1826 = vmatpush.msra.mxu1 %v2313_v52  ;;  %1852 = vmatpush.msra.mxu2 %v2314_v14 }
 0xb56   :  { %1908 = vmatpush.msra.mxu0 %v126_v58 }
 0xb58   :  { %1909 = vmatpush.msra.mxu0 %v125_v37 }
 0xb5a   :  { %2250 = vmatmul.msk.f32.vlgmr.msrb.gmra.mxu1 %vm247_vm8, %v1645_v26  ;;  %2251 = vmatmul.msk.f32.vlgmr.msrb.gmra.mxu2 %vm247_vm8, %v1646_v28 }
 0xb62   :  { %2256 = vmatmul.msk.f32.vlgmr.msra.gmra.mxu1 %vm247_vm8, %v1803_v0  ;;  %2257 = vmatmul.msk.f32.vlgmr.msra.gmra.mxu2 %vm247_vm8, %v1804_v18 }
 0xbac   :  { %v1354_v22 = vpop.f32.mrf.mxu1 }
 0xbb5   :  { %v1380_v13 = vpop.f32.mrf.mxu2 }
 0xbcf   :  { %v1512_v29 = vpop.f32.mrf.mxu1 }
 0xbd0   :  { %1859 = vrot.lane.b32.xlu0 %v1512_v29, %s2550_s21  ;;  %v1963_v29 = vperm.slane %v3009_v44, 1 }
 0xbd5   :  { %v1538_v32 = vpop.f32.mrf.mxu2 }
 0xbd7   :  { %v1670_v33 = vpop.f32.mrf.mxu1 }
 0xbd8   :  { %1861 = vrot.lane.b32.xlu0 %v1538_v32, %s2550_s21  ;;  %1867 = vrot.lane.b32.xlu1 %v1670_v33, %s3367_s4 }
 0xbdd   :  { %v1696_v34 = vpop.f32.mrf.mxu2 }
 0xbdf   :  { %v1828_v35 = vpop.f32.mrf.mxu1 }
 0xbe0   :  { %1869 = vrot.lane.b32.xlu1 %v1696_v34, %s3367_s4  ;;  %1875 = vrot.lane.b32.xlu2 %v1828_v35, %s2566_s14  ;;  %v1966_v35 = vperm.slane %v3011_v16, 1 }
 0xbe5   :  { %v1854_v27 = vpop.f32.mrf.mxu2 }
 0xbe8   :  { %1877 = vrot.lane.b32.xlu2 %v1854_v27, %s2566_s14 }
 0xc3a   :  { %v1876_v47 = vpop.permute.xlu2 %1875 }
 0xc42   :  { %v1860_v43 = vpop.permute.xlu0 %1859  ;;  %v1878_v56 = vpop.permute.xlu2 %1877 }
 0xc43   :  { %v1881_v50 = vsel %vm247_vm8, %v1354_v22, %v1860_v43 }
 0xc4a   :  { %v1868_v42 = vpop.permute.xlu1 %1867  ;;  %v1862_v53 = vpop.permute.xlu0 %1861 }
 0xc4b   :  { %v1883_v45 = vsel %vm901_vm13, %v1881_v50, %v1868_v42  ;;  %v1882_v54 = vsel %vm247_vm8, %v1380_v13, %v1862_v53  ;;  %v2415_v42 = vld [vmem:[#allocation8] sm:$0x3] }
 0xc4c   :  { %v1885_v48 = vsel %vm904_vm14, %v1883_v45, %v1876_v47  ;;  %v1969_v45 = vperm.slane %v2415_v42, 1 }
 0xc4d   :  { %2258 = vmatmul.msk.f32.vlgmr.msra.gmra.mxu0 %vm156_vm0, %v1885_v48 }
 0xc52   :  { %v1870_v55 = vpop.permute.xlu1 %1869 }
 0xc53   :  { %v1884_v57 = vsel %vm901_vm13, %v1882_v54, %v1870_v55 }
 0xc54   :  { %v1886_v2 = vsel %vm904_vm14, %v1884_v57, %v1878_v56  ;;  %v154_v57 = vld [vmem:[%s3351_s9 + $0x78] sm:$0xff] }
 0xc55   :  { %2259 = vmatmul.msk.f32.gmra.mxu0 %vm156_vm0, %v1886_v2  ;;  %2102 = vmatpush.msrb.mxu1 %v154_v57 }
 0xcca   :  { %v1911_v4 = vpop.f32.mrf.mxu0 }
 0xccb   :  { %v1912_v5 = vadd.f32 %v1911_v4, %v1887_v1  ;;  %v153_v4 = vld [vmem:[%s3351_s9 + $0x70] sm:$0xff] }
 0xccc   :  { %2103 = vmatpush.msrb.mxu1 %v153_v4 }
 0xccd   :  { %v3236_v6 = vadd.f32 %v1912_v5, %v2980_v17 }
 0xccf   :  { %v1919_v8 = vsel %vm156_vm0, %v3236_v6, 0.0 }
 0xcd0   :  { %1920 = vadd.xlane.f32.xlu0 %v1919_v8 }
 0xcd2   :  { %v1914_v9 = vpop.f32.mrf.mxu0 }
 0xcd3   :  { %v1915_v61 = vadd.f32 %v1914_v9, %v1887_v1 }
 0xcd5   :  { %v3241_v11 = vadd.f32 %v1915_v61, %v2985_v19  ;;  %v152_v61 = vld [vmem:[%s3351_s9 + $0x68] sm:$0xff] }
 0xcd6   :  { %2104 = vmatpush.msrb.mxu1 %v152_v61 }
 0xcd7   :  { %v1922_v62 = vsel %vm156_vm0, %v3241_v11, 0.0 }
 0xcd8   :  { %1923 = vadd.xlane.f32.xlu1 %v1922_v62 }
 0xd43   :  { %v1921_v39 = vpop.xlane.xlu0 %1920 }
 0xd44   :  { %v1925_v7 = vmul.f32 %v1921_v39, %v2662_v10 }
 0xd46   :  { %v1927_v14 = vsub.f32 %v3236_v6, %v1925_v7 }
 0xd48   :  { %v1929_v17 = vmul.f32 %v1927_v14, %v1927_v14 }
 0xd4a   :  { %v1931_v52 = vsel %vm156_vm0, %v1929_v17, 0.0 }
 0xd4b   :  { %1932 = vadd.xlane.f32.xlu2 %v1931_v52  ;;  %v1924_v15 = vpop.xlane.xlu1 %1923 }
 0xd4c   :  { %v1926_v21 = vmul.f32 %v1924_v15, %v2662_v10  ;;  %v150_v15 = vld [vmem:[%s3351_s9 + $0x58] sm:$0xff] }
 0xd4e   :  { %v1928_v41 = vsub.f32 %v3241_v11, %v1926_v21 }
 0xd50   :  { %v1930_v19 = vmul.f32 %v1928_v41, %v1928_v41 }
 0xd52   :  { %v1934_v12 = vsel %vm156_vm0, %v1930_v19, 0.0 }
 0xd53   :  { %1935 = vadd.xlane.f32.xlu0 %v1934_v12  ;;  %v149_v12 = vld [vmem:[%s3351_s9 + $0x50] sm:$0xff] }
 0xdbe   :  { %v1933_v46 = vpop.xlane.xlu2 %1932 }
 0xdbf   :  { %v1937_v23 = vmul.f32 %v1933_v46, %v2662_v10  ;;  %v148_v46 = vld [vmem:[%s3351_s9 + $0x48] sm:$0xff] }
 0xdc1   :  { %v1939_v26 = vadd.f32 1e-06, %v1937_v23 }
 0xdc3   :  { %2401 = vrsqrt.f32 %v1939_v26  ;;  %vm1947_vm13 = vweird.f32 %v1939_v26 }
 0xdc6   :  { %v1936_v28 = vpop.xlane.xlu0 %1935 }
 0xdc7   :  { %v1938_v30 = vmul.f32 %v1936_v28, %v2662_v10 }
 0xdc9   :  { %v2402_v3 = vpop.eup %2401  ;;  %v1940_v59 = vadd.f32 1e-06, %v1938_v30  ;;  %v147_v30 = vld [vmem:[%s3351_s9 + $0x40] sm:$0xff] }
 0xdca   :  { %v1942_v36 = vmul.f32 %v2402_v3, %v1939_v26  ;;  %vm1948_vm8 = vweird.f32 %v2402_v3 }
 0xdcb   :  { %2403 = vrsqrt.f32 %v1940_v59  ;;  %vm1949_vm14 = vmor %vm1947_vm13, %vm1948_vm8  ;;  %vm1957_vm11 = vweird.f32 %v1940_v59 }
 0xdcc   :  { %v1943_v31 = vmul.f32 %v2402_v3, %v1942_v36 }
 0xdce   :  { %v1944_v40 = vmul.f32 0.5, %v1943_v31 }
 0xdd0   :  { %v1945_v0 = vsub.f32 1.5, %v1944_v40 }
 0xdd1   :  { %v2404_v18 = vpop.eup %2403 }
 0xdd2   :  { %v1946_v22 = vmul.f32 %v2402_v3, %v1945_v0  ;;  %v1952_v13 = vmul.f32 %v2404_v18, %v1940_v59  ;;  %vm1958_vm10 = vweird.f32 %v2404_v18 }
 0xdd3   :  { %vm1959_vm12 = vmor %vm1957_vm11, %vm1958_vm10 }
 0xdd4   :  { %v1950_v32 = vsel %vm1949_vm14, %v2402_v3, %v1946_v22  ;;  %v1953_v33 = vmul.f32 %v2404_v18, %v1952_v13 }
 0xdd5   :  { %v1961_v34 = vmul.f32 %v1950_v32, %v1927_v14  ;;  %v151_v14 = vld [vmem:[%s3351_s9 + $0x60] sm:$0xff] }
 0xdd6   :  { %v1954_v27 = vmul.f32 0.5, %v1953_v33  ;;  %2105 = vmatpush.msrb.mxu1 %v151_v14 }
 0xdd7   :  { %v1964_v51 = vmul.f32 %v1963_v29, %v1961_v34 }
 0xdd8   :  { %v1955_v60 = vsub.f32 1.5, %v1954_v27  ;;  %2106 = vmatpush.msrb.mxu1 %v150_v15 }
 0xdd9   :  { %v1967_v58 = vadd.f32 %v1966_v35, %v1964_v51 }
 0xdda   :  { %v1956_v37 = vmul.f32 %v2404_v18, %v1955_v60  ;;  %2107 = vmatpush.msrb.mxu1 %v149_v12 }
 0xddb   :  { %2260 = vmatmul.msk.f32.vlgmr.msrb.gmra.mxu3 %vm156_vm0, %v1967_v58 }
 0xddc   :  { %v1960_v43 = vsel %vm1959_vm12, %v2404_v18, %v1956_v37  ;;  %2108 = vmatpush.msrb.mxu1 %v148_v46 }
 0xddd   :  { %v1962_v47 = vmul.f32 %v1960_v43, %v1928_v41 }
 0xdde   :  { %2109 = vmatpush.msrb.mxu1 %v147_v30 }
 0xddf   :  { %v1965_v50 = vmul.f32 %v1963_v29, %v1962_v47 }
 0xde1   :  { %v1968_v44 = vadd.f32 %v1966_v35, %v1965_v50 }
 0xde3   :  { %2261 = vmatmul.msk.f32.gmra.mxu3 %vm156_vm0, %v1968_v44 }
 0xe5e   :  { %v1993_v48 = vpop.f32.mrf.mxu3 }
 0xe5f   :  { %v3269_v16 = vadd.f32 %v1993_v48, %v1969_v45 }
 0xe61   :  { %v3273_v53 = vmul.f32 %v3269_v16, %v2928_v38 }
 0xe63   :  { %v2003_v54 = vmul.f32 %v3273_v53, %v3273_v53 }
 0xe65   :  { %v2004_v55 = vmin.f32 %v2003_v54, 16.0 }
 0xe66   :  { %v1996_v56 = vpop.f32.mrf.mxu3 }
 0xe67   :  { %v2005_v2 = vmul.f32 2.1237322e-06, %v2004_v55  ;;  %v2016_v63 = vmul.f32 3.8918573e-05, %v2004_v55  ;;  %v3280_v1 = vadd.f32 %v1996_v56, %v1969_v45 }
 0xe69   :  { %v2006_v5 = vadd.f32 0.00028619796, %v2005_v2  ;;  %v2017_v8 = vadd.f32 0.001143296, %v2016_v63  ;;  %v3287_v9 = vmul.f32 %v3280_v1, %v2928_v38 }
 0xe6b   :  { %v2007_v62 = vmul.f32 %v2006_v5, %v2004_v55  ;;  %v2018_v39 = vmul.f32 %v2017_v8, %v2004_v55  ;;  %v2043_v7 = vmul.f32 %v3287_v9, %v3287_v9 }
 0xe6d   :  { %v2019_v17 = vadd.f32 0.014752088, %v2018_v39  ;;  %v2044_v52 = vmin.f32 %v2043_v7, 16.0  ;;  %v2008_v38 = vadd.f32 0.0036580483, %v2007_v62 }
 0xe6f   :  { %v2020_v21 = vmul.f32 %v2019_v17, %v2004_v55  ;;  %v2045_v41 = vmul.f32 2.1237322e-06, %v2044_v52  ;;  %v2056_v19 = vmul.f32 3.8918573e-05, %v2044_v52  ;;  %v2009_v24 = vmul.f32 %v2008_v38, %v2004_v55 }
 0xe70   :  { %v1999_v38 = vmul.f32 0.5, %v3269_v16  ;;  %v2416_v16 = vld [vmem:[%s3352_s10] sm:$0x3] }
 0xe71   :  { %v2021_v49 = vadd.f32 0.112945676, %v2020_v21  ;;  %v2046_v20 = vadd.f32 0.00028619796, %v2045_v41  ;;  %v2057_v25 = vadd.f32 0.001143296, %v2056_v19 }
 0xe72   :  { %v2010_v59 = vadd.f32 0.05243302, %v2009_v24  ;;  %v2000_v24 = vmul.f32 0.5, %v3280_v1 }
 0xe73   :  { %v2022_v23 = vmul.f32 %v2021_v49, %v2004_v55  ;;  %v2047_v26 = vmul.f32 %v2046_v20, %v2044_v52  ;;  %v2058_v28 = vmul.f32 %v2057_v25, %v2044_v52 }
 0xe74   :  { %v2011_v22 = vmul.f32 %v2010_v59, %v2004_v55 }
 0xe75   :  { %v2023_v3 = vadd.f32 0.4994258, %v2022_v23  ;;  %v2059_v36 = vadd.f32 0.014752088, %v2058_v28  ;;  %v2048_v40 = vadd.f32 0.0036580483, %v2047_v26 }
 0xe76   :  { %v2012_v33 = vadd.f32 0.18741608, %v2011_v22  ;;  %v2087_v23 = vperm.slane %v2416_v16, 1 }
 0xe77   :  { %v2024_v31 = vmul.f32 %v2023_v3, %v2004_v55  ;;  %v2060_v0 = vmul.f32 %v2059_v36, %v2044_v52  ;;  %v2049_v29 = vmul.f32 %v2048_v40, %v2044_v52 }
 0xe78   :  { %v2013_v60 = vmul.f32 %v2012_v33, %v2004_v55 }
 0xe79   :  { %v2025_v18 = vadd.f32 1.0, %v2024_v31  ;;  %v2061_v13 = vadd.f32 0.112945676, %v2060_v0  ;;  %v2050_v35 = vadd.f32 0.05243302, %v2049_v29 }
 0xe7a   :  { %v2014_v44 = vadd.f32 1.1283791, %v2013_v60 }
 0xe7b   :  { %2405 = vrcp.f32 %v2025_v18  ;;  %v2062_v32 = vmul.f32 %v2061_v13, %v2044_v52  ;;  %v2051_v43 = vmul.f32 %v2050_v35, %v2044_v52  ;;  %v2037_v50 = vand.u32 2147483648, %v2025_v18 }
 0xe7c   :  { %v2035_v45 = vand.u32 2147483647, %v2025_v18  ;;  %vm2031_vm2 = vweird.f32 %v2025_v18  ;;  %v2015_v2 = vmul.f32 %v2014_v44, %v3273_v53 }
 0xe7d   :  { %v2063_v34 = vadd.f32 0.4994258, %v2062_v32  ;;  %v2052_v48 = vadd.f32 0.18741608, %v2051_v43  ;;  %v2038_v56 = vor.u32 1.1754944e-38, %v2037_v50 }
 0xe7e   :  { %vm2036_vm4 = vcmp.eq.f32.partialorder %v2035_v45, 8.507059e+37  ;;  %v2315_v45 = vld [vmem:[%s3353_s11] ss:$0 sm:$0xff]  ;;  %s2568_s11 = smov [#allocation10]  }
 0xe7f   :  { %v2064_v27 = vmul.f32 %v2063_v34, %v2044_v52  ;;  %v2053_v4 = vmul.f32 %v2052_v48, %v2044_v52  ;;  %s2181_s14 = sshll.u32 %s2568_s11, 4  ;;  %s2182_s14 = int_to_ptr.vmem [resolvable:$true] %s2181_s14 }
 0xe81   :  { %v2406_v51 = vpop.eup %2405  ;;  %v2065_v37 = vadd.f32 1.0, %v2064_v27  ;;  %v2054_v7 = vadd.f32 1.1283791, %v2053_v4 }
 0xe82   :  { %v2027_v58 = vmul.f32 %v2406_v51, %v2025_v18  ;;  %vm2032_vm15 = vweird.f32 %v2406_v51 }
 0xe83   :  { %2407 = vrcp.f32 %v2065_v37  ;;  %vm2033_vm3 = vmor %vm2031_vm2, %vm2032_vm15  ;;  %v2077_v39 = vand.u32 2147483648, %v2065_v37  ;;  %v2075_v17 = vand.u32 2147483647, %v2065_v37  ;;  %vm2071_vm6 = vweird.f32 %v2065_v37 }
 0xe84   :  { %v2028_v47 = vsub.f32 1.0, %v2027_v58  ;;  %v2055_v19 = vmul.f32 %v2054_v7, %v3287_v9 }
 0xe85   :  { %v2078_v53 = vor.u32 1.1754944e-38, %v2077_v39  ;;  %vm2076_vm9 = vcmp.eq.f32.partialorder %v2075_v17, 8.507059e+37 }
 0xe86   :  { %v2029_v42 = vmul.f32 %v2406_v51, %v2028_v47 }
 0xe88   :  { %v2030_v54 = vadd.f32 %v2406_v51, %v2029_v42 }
 0xe89   :  { %v2408_v57 = vpop.eup %2407 }
 0xe8a   :  { %v2034_v63 = vsel %vm2033_vm3, %v2406_v51, %v2030_v54  ;;  %v2067_v5 = vmul.f32 %v2408_v57, %v2065_v37  ;;  %vm2072_vm5 = vweird.f32 %v2408_v57 }
 0xe8b   :  { %v2039_v55 = vsel %vm2036_vm4, %v2038_v56, %v2034_v63  ;;  %vm2073_vm7 = vmor %vm2071_vm6, %vm2072_vm5 }
 0xe8c   :  { %v2040_v8 = vmul.f32 %v2039_v55, %v2015_v2  ;;  %v2068_v61 = vsub.f32 1.0, %v2067_v5 }
 0xe8e   :  { %v2262_v62 = vclamps-f32 %v2040_v8, 1.0  ;;  %v2069_v14 = vmul.f32 %v2408_v57, %v2068_v61 }
 0xe90   :  { %v2083_v15 = vadd.f32 1.0, %v2262_v62  ;;  %v2070_v21 = vadd.f32 %v2408_v57, %v2069_v14 }
 0xe92   :  { %v2085_v41 = vmul.f32 %v2083_v15, %v1999_v38  ;;  %v2074_v52 = vsel %vm2073_vm7, %v2408_v57, %v2070_v21  ;;  %v2316_v57 = vld [vmem:[%s3354_s12] ss:$0 sm:$0xff]  ;;  %s3368_s12 = smov 128  }
 0xe93   :  { %v2079_v12 = vsel %vm2076_vm9, %v2078_v53, %v2074_v52 }
 0xe94   :  { %2264 = vmatmul.msk.f32.vlgmr.msrb.gmra.mxu1 %vm1115_vm1, %v2085_v41  ;;  %v2080_v49 = vmul.f32 %v2079_v12, %v2055_v19 }
 0xe96   :  { %v2263_v20 = vclamps-f32 %v2080_v49, 1.0 }
 0xe98   :  { %v2084_v25 = vadd.f32 1.0, %v2263_v20 }
 0xe9a   :  { %v2086_v46 = vmul.f32 %v2084_v25, %v2000_v24 }
 0xe9c   :  { %2265 = vmatmul.msk.f32.gmra.mxu1 %vm1115_vm1, %v2086_v46 }
 0xf11   :  { %v2111_v26 = vpop.f32.mrf.mxu1 }
 0xf12   :  { %v2112_v9 = vadd.f32 %v2111_v26, %v2087_v23 }
 0xf14   :  { %v2117_v28 = vadd.f32 %v2112_v9, %v3236_v6 }
 0xf16   :  { %v2121_v30 = vsel %vm156_vm0, %v2117_v28, 0.0 }
 0xf17   :  { %2122 = vadd.xlane.f32.xlu1 %v2121_v30 }
 0xf19   :  { %v2114_v3 = vpop.f32.mrf.mxu1 }
 0xf1a   :  { %v2115_v59 = vadd.f32 %v2114_v3, %v2087_v23 }
 0xf1c   :  { %v2118_v1 = vadd.f32 %v2115_v59, %v3241_v11 }
 0xf1e   :  { %v2124_v36 = vsel %vm156_vm0, %v2118_v1, 0.0 }
 0xf1f   :  { %2125 = vadd.xlane.f32.xlu2 %v2124_v36 }
 0xf8a   :  { %v2123_v31 = vpop.xlane.xlu1 %2122 }
 0xf8b   :  { %v2127_v40 = vmul.f32 %v2123_v31, %v2662_v10 }
 0xf8d   :  { %v2129_v0 = vsub.f32 %v2117_v28, %v2127_v40 }
 0xf8f   :  { %v2131_v18 = vmul.f32 %v2129_v0, %v2129_v0 }
 0xf91   :  { %v2133_v22 = vsel %vm156_vm0, %v2131_v18, 0.0 }
 0xf92   :  { %2134 = vadd.xlane.f32.xlu0 %v2133_v22  ;;  %v2126_v13 = vpop.xlane.xlu2 %2125 }
 0xf93   :  { %v2128_v6 = vmul.f32 %v2126_v13, %v2662_v10 }
 0xf95   :  { %v2130_v29 = vsub.f32 %v2118_v1, %v2128_v6 }
 0xf97   :  { %v2132_v32 = vmul.f32 %v2130_v29, %v2130_v29 }
 0xf99   :  { %v2136_v33 = vsel %vm156_vm0, %v2132_v32, 0.0 }
 0xf9a   :  { %2137 = vadd.xlane.f32.xlu1 %v2136_v33 }
0x1005   :  { %v2135_v11 = vpop.xlane.xlu0 %2134 }
0x1006   :  { %v2139_v34 = vmul.f32 %v2135_v11, %v2662_v10 }
0x1008   :  { %v2141_v35 = vadd.f32 1e-06, %v2139_v34 }
0x100a   :  { %2409 = vrsqrt.f32 %v2141_v35  ;;  %vm2149_vm8 = vweird.f32 %v2141_v35 }
0x100d   :  { %v2138_v27 = vpop.xlane.xlu1 %2137 }
0x100e   :  { %v2140_v51 = vmul.f32 %v2138_v27, %v2662_v10 }
0x1010   :  { %v2410_v60 = vpop.eup %2409  ;;  %v2142_v37 = vadd.f32 1e-06, %v2140_v51 }
0x1011   :  { %v2144_v58 = vmul.f32 %v2410_v60, %v2141_v35  ;;  %vm2150_vm1 = vweird.f32 %v2410_v60 }
0x1012   :  { %2411 = vrsqrt.f32 %v2142_v37  ;;  %vm2151_vm13 = vmor %vm2149_vm8, %vm2150_vm1  ;;  %vm2159_vm10 = vweird.f32 %v2142_v37 }
0x1013   :  { %v2145_v43 = vmul.f32 %v2410_v60, %v2144_v58 }
0x1015   :  { %v2146_v47 = vmul.f32 0.5, %v2145_v43 }
0x1017   :  { %v2147_v50 = vsub.f32 1.5, %v2146_v47 }
0x1018   :  { %v2412_v44 = vpop.eup %2411 }
0x1019   :  { %v2148_v42 = vmul.f32 %v2410_v60, %v2147_v50  ;;  %v2154_v48 = vmul.f32 %v2412_v44, %v2142_v37  ;;  %vm2160_vm14 = vweird.f32 %v2412_v44 }
0x101a   :  { %vm2161_vm11 = vmor %vm2159_vm10, %vm2160_vm14 }
0x101b   :  { %v2152_v54 = vsel %vm2151_vm13, %v2410_v60, %v2148_v42  ;;  %v2155_v10 = vmul.f32 %v2412_v44, %v2154_v48 }
0x101c   :  { %v2163_v56 = vmul.f32 %v2152_v54, %v2129_v0 }
0x101d   :  { %v2156_v63 = vmul.f32 0.5, %v2155_v10 }
0x101e   :  { %v2168_v2 = vmul.f32 %v2315_v45, %v2163_v56 }
0x101f   :  { %v2157_v55 = vsub.f32 1.5, %v2156_v63 }
0x1020   :  { %v2173_v4 = vadd.f32 %v2316_v57, %v2168_v2 }
0x1021   :  { %v2158_v5 = vmul.f32 %v2412_v44, %v2157_v55 }
0x1022   :  { %2175 = vst.msk [vmem:[#allocation10] sm:$0xff] %vm156_vm0, %v2173_v4 }
0x1023   :  { %v2162_v8 = vsel %vm2161_vm11, %v2412_v44, %v2158_v5 }
0x1024   :  { %v2164_v61 = vmul.f32 %v2162_v8, %v2130_v29 }
0x1026   :  { %v2169_v62 = vmul.f32 %v2315_v45, %v2164_v61 }
0x1028   :  { %v2174_v39 = vadd.f32 %v2316_v57, %v2169_v62 }
0x102a   :  { %2176 = vst.msk [vmem:[#allocation10 + $0x8] sm:$0xff] %vm156_vm0, %v2174_v39 }
0x102b   :  { %2189 = dma.vmem_to_hbm [thread:$0]  %s2182_s14, 256, %s2184_s1, [#allocation4], %s3368_s12, %s3368_s12, %s2550_s21  }
0x102c   :  { %2543 = dma.done.wait [#allocation4], 256  }
0x102d   :  { %2544 = vsyncadd [#allocation4], 4294967040 }
0x102e   :  { %2194 = vsyncpa [#allocation3], 1 }
0x102f   :  { %2195 = vsyncpa [#allocation6], 1 }
0x1030   :  { %2196 = vsyncpa [#allocation9], 1 }
0x1031   :  { %2197 = vsyncpa [#allocation4], 1 }

</bundles_post_ra>
